<compile_context>
chip_gen: v7x
topology: tpu7x:2x2x1
jax: 0.10.0
libtpu: 0.0.40
codegen_flags: <defaults>
</compile_context>

<pallas_src>
import functools

import jax
import jax.numpy as jnp
from jax.experimental import pallas as pl
from jax.experimental.pallas import tpu as pltpu

_SUBLANE = 8


def _round_up(x: int, m: int) -> int:
    return ((x + m - 1) // m) * m


def _feature_pad_multiple() -> int:
    # v6e/v7x MXUs are 256x256 -> pad feature dims to 256 so small matmuls fill
    # the array; v5e's MXU is 128-wide so 128 is enough there.
    try:
        kind = jax.devices()[0].device_kind.lower()
    except Exception:
        return 128
    if "v5 lite" in kind or "v5e" in kind or "v5litepod" in kind:
        return 128
    return 256


def _vmem_budget_bytes() -> int:
    # Scoped-VMEM budget: ~7/8 of physical, capped at 100 MiB (headroom for
    # compiler scratch / activation tiles).  Defaults are only 16/32 MiB.
    try:
        cap = pltpu.get_tpu_info().vmem_capacity_bytes
    except Exception:
        cap = 64 * 1024 * 1024          # conservative: v7x has 64 MiB per TC
    return min(int(cap * 7 // 8), 100 * 1024 * 1024)


def _pick_tile(dim: int, candidates=(512, 256, 128)) -> int:
    for c in candidates:
        if dim % c == 0:
            return c
    return dim


def _pick_tm(mp: int) -> int:
    # Big batch tile (>=256, up to 512) amortizes the ~0.35us/grid-step overhead,
    # but keep >=2 grid steps when batch allows so the "parallel" axis can shard
    # across both v7x TensorCores.
    if mp <= 256:
        return mp
    return min(512, _round_up(mp // 2, 256))


# ----------------------------------------------------------------------------
# Fused path: whole MLP in one kernel, all (padded, bf16) weights resident.
# ----------------------------------------------------------------------------
def _fused_mlp_kernel(*refs, num_layers: int, approx_gelu: bool):
    x_ref = refs[0]
    o_ref = refs[-1]
    wb = refs[1:-1]

    y = x_ref[...]                                  # bf16 [tm, Kp]
    for i in range(num_layers):
        w = wb[2 * i][...]                          # bf16 [K_i, N_i]
        b = wb[2 * i + 1][...]                      # f32  [1, N_i]
        acc = jnp.dot(y, w, preferred_element_type=jnp.float32) + b
        if i < num_layers - 1:
            # tanh-approx GELU runs on the EUP slot; exact erf is a long VPU
            # polynomial.  GELU(0)=0 either way, so padded lanes stay zero.
            acc = jax.nn.gelu(acc, approximate=approx_gelu)
            y = acc.astype(jnp.bfloat16)            # back to bf16 for next MXU pass
        else:
            y = acc
    o_ref[...] = y.astype(o_ref.dtype)


def _fused_call(xp, padded_params, tm, Np, approx_gelu, vmem_limit,
                single_buffer_weights):
    num_layers = len(padded_params)
    Mp, Kp = xp.shape

    flat = []
    in_specs = [pl.BlockSpec((tm, Kp), lambda i: (i, 0))]
    for w, b in padded_params:
        flat += [w, b]
        if single_buffer_weights:
            # Constant index_map -> never re-fetched across grid steps; a single
            # buffer halves the dominant (weight) VMEM consumer.
            in_specs.append(pl.BlockSpec(w.shape, lambda i: (0, 0),
                                         pipeline_mode=pl.Buffered(1)))
            in_specs.append(pl.BlockSpec(b.shape, lambda i: (0, 0),
                                         pipeline_mode=pl.Buffered(1)))
        else:
            in_specs.append(pl.BlockSpec(w.shape, lambda i: (0, 0)))
            in_specs.append(pl.BlockSpec(b.shape, lambda i: (0, 0)))

    flops = 2 * Mp * sum(w.shape[0] * w.shape[1] for w, _ in padded_params)
    transc = Mp * sum(w.shape[1] for w, _ in padded_params[:-1])
    bytes_acc = (Mp * Kp * 2 + Mp * Np * 4
                 + sum(w.size * w.dtype.itemsize + b.size * b.dtype.itemsize
                       for w, b in padded_params))

    kernel = functools.partial(_fused_mlp_kernel, num_layers=num_layers,
                               approx_gelu=approx_gelu)
    return pl.pallas_call(
        kernel,
        out_shape=jax.ShapeDtypeStruct((Mp, Np), jnp.float32),
        grid=(Mp // tm,),
        in_specs=in_specs,
        out_specs=pl.BlockSpec((tm, Np), lambda i: (i, 0)),
        compiler_params=pltpu.CompilerParams(
            dimension_semantics=("parallel",),
            vmem_limit_bytes=vmem_limit),
        cost_estimate=pl.CostEstimate(flops=flops, transcendentals=transc,
                                      bytes_accessed=bytes_acc),
    )(xp, *flat)


def _fused_fits(padded_params, tm, Kp, Np, budget) -> bool:
    weight_bytes = sum(w.size * w.dtype.itemsize + b.size * b.dtype.itemsize
                       for w, b in padded_params)
    max_h = max(w.shape[1] for w, _ in padded_params)
    # x tile (bf16) + out tile (f32) double-buffered by the pipeline, plus the
    # largest intermediate activation (f32 acc + its bf16 recast).
    act_bytes = 2 * tm * Kp * 2 + 2 * tm * Np * 4 + tm * max_h * (4 + 2)
    return weight_bytes + act_bytes <= budget


# ----------------------------------------------------------------------------
# Fallback path: per-layer K/N-tiled pipelined matmul (+bias (+GELU)).
# Used when the resident-weight fused kernel would overflow the VMEM budget.
# ----------------------------------------------------------------------------
def _tiled_linear_kernel(x_ref, w_ref, b_ref, o_ref, acc_ref, *,
                         apply_gelu: bool, approx_gelu: bool):
    k = pl.program_id(2)

    @pl.when(k == 0)
    def _():
        acc_ref[...] = jnp.zeros_like(acc_ref)

    acc_ref[...] += jnp.dot(x_ref[...], w_ref[...],
                            preferred_element_type=jnp.float32)

    @pl.when(k == pl.num_programs(2) - 1)
    def _():
        y = acc_ref[...] + b_ref[...]
        if apply_gelu:
            y = jax.nn.gelu(y, approximate=approx_gelu)
        o_ref[...] = y.astype(o_ref.dtype)


def _linear_tiled(x, w, b, *, tm, apply_gelu, approx_gelu, out_dtype, vmem_limit):
    M, K = x.shape
    _, N = w.shape
    tk = _pick_tile(K)
    tn = _pick_tile(N)
    out_itemsize = 2 if out_dtype == jnp.bfloat16 else 4

    flops = 2 * M * K * N
    transc = M * N if apply_gelu else 0
    bytes_acc = (x.size * x.dtype.itemsize + w.size * w.dtype.itemsize
                 + b.size * b.dtype.itemsize + M * N * out_itemsize)

    kernel = functools.partial(_tiled_linear_kernel, apply_gelu=apply_gelu,
                               approx_gelu=approx_gelu)
    return pl.pallas_call(
        kernel,
        out_shape=jax.ShapeDtypeStruct((M, N), out_dtype),
        grid=(M // tm, N // tn, K // tk),
        in_specs=[pl.BlockSpec((tm, tk), lambda i, j, k: (i, k)),
                  pl.BlockSpec((tk, tn), lambda i, j, k: (k, j)),
                  pl.BlockSpec((1, tn), lambda i, j, k: (0, j))],
        out_specs=pl.BlockSpec((tm, tn), lambda i, j, k: (i, j)),
        scratch_shapes=[pltpu.VMEM((tm, tn), jnp.float32)],
        compiler_params=pltpu.CompilerParams(
            dimension_semantics=("parallel", "parallel", "arbitrary"),
            vmem_limit_bytes=vmem_limit),
        cost_estimate=pl.CostEstimate(flops=flops, transcendentals=transc,
                                      bytes_accessed=bytes_acc),
    )(x, w, b)


# ----------------------------------------------------------------------------
# Param prep & forward wrapper
# ----------------------------------------------------------------------------
def init_mlp_params(key, input_dim, hidden_dim, output_dim, num_layers):
    """Params matching nn.Linear default init U(-1/sqrt(in), 1/sqrt(in)).
    Weights stored [in, out] (kernel layout), f32."""
    h = [hidden_dim] * (num_layers - 1)
    dims_in = [input_dim] + h
    dims_out = h + [output_dim]
    params = []
    for n_in, n_out in zip(dims_in, dims_out):
        key, kw, kb = jax.random.split(key, 3)
        bound = 1.0 / jnp.sqrt(jnp.float32(n_in))
        w = jax.random.uniform(kw, (n_in, n_out), jnp.float32, -bound, bound)
        b = jax.random.uniform(kb, (n_out,), jnp.float32, -bound, bound)
        params.append((w, b))
    return params


def pad_params(params, pad=None):
    """One-time prep: zero-pad feature dims to a lane-dense multiple (256 on
    v6e/v7x, 128 on v5e), cast weights to bf16 (MXU-native), keep biases f32
    reshaped to [1, N_pad].  Padded rows/cols are zero; GELU(0)=0 keeps padded
    lanes exactly zero layer-to-layer."""
    if pad is None:
        pad = _feature_pad_multiple()
    padded = []
    for w, b in params:
        k, n = w.shape
        kp, np_ = _round_up(k, pad), _round_up(n, pad)
        wp = jnp.zeros((kp, np_), jnp.bfloat16).at[:k, :n].set(w.astype(jnp.bfloat16))
        bp = jnp.zeros((1, np_), jnp.float32).at[0, :n].set(b.astype(jnp.float32))
        padded.append((wp, bp))
    return padded


def mlp_forward(padded_params, x, output_dim, *, approx_gelu=True, force_tiled=False):
    """Run the MLP.  x: [M, input_dim] f32 -> [M, output_dim] f32."""
    num_layers = len(padded_params)
    M, K = x.shape
    Kp = padded_params[0][0].shape[0]
    Np = padded_params[-1][0].shape[1]
    assert K <= Kp

    Mp = _round_up(max(M, _SUBLANE), _SUBLANE)
    tm = _pick_tm(Mp)
    Mp = _round_up(Mp, tm)

    # Pad batch / features and cast activations to bf16 once.
    xp = jnp.zeros((Mp, Kp), jnp.bfloat16).at[:M, :K].set(x.astype(jnp.bfloat16))

    budget = _vmem_budget_bytes()
    use_fused = (not force_tiled) and _fused_fits(padded_params, tm, Kp, Np, budget)

    if use_fused:
        try:
            out_padded = jax.block_until_ready(
                _fused_call(xp, padded_params, tm, Np, approx_gelu, budget,
                            single_buffer_weights=True))
        except Exception:
            # Older Pallas without single-buffer pipeline_mode support: fall back
            # to default double-buffered resident weights.
            out_padded = _fused_call(xp, padded_params, tm, Np, approx_gelu,
                                     budget, single_buffer_weights=False)
    else:
        # Weights too large to keep resident: stream each layer's weights in
        # (tk, tn) chunks through a pipelined Pallas matmul with an f32 VMEM
        # accumulator; intermediate activations stay bf16.
        y = xp
        for i, (w, b) in enumerate(padded_params):
            last = i == num_layers - 1
            y = _linear_tiled(y, w, b, tm=tm,
                              apply_gelu=not last, approx_gelu=approx_gelu,
                              out_dtype=jnp.float32 if last else jnp.bfloat16,
                              vmem_limit=budget)
        out_padded = y

    # Strip padding (layout plumbing only).
    return out_padded[:M, :output_dim]


if __name__ == "__main__":
    key = jax.random.PRNGKey(0)
    batch = 8
    input_dim, hidden_dim, output_dim, num_layers = 32, 64, 16, 3

    kparams, kx = jax.random.split(key)
    params = init_mlp_params(kparams, input_dim, hidden_dim, output_dim, num_layers)
    padded_params = pad_params(params)   # done once, reused every forward
    x = jax.random.normal(kx, (batch, input_dim), jnp.float32)

    # Fused (weights-resident) path.
    out = jax.block_until_ready(mlp_forward(padded_params, x, output_dim))

    # Also exercise the K/N-tiled fallback path (used when weights overflow VMEM).
    out_tiled = jax.block_until_ready(
        mlp_forward(padded_params, x, output_dim, force_tiled=True))

    # Reference: f32, exact erf-GELU (torch.nn.functional.gelu default).
    # bf16 matmuls + tanh-approx GELU change numerics slightly -> loose tolerance.
    ref = x
    for i, (w, b) in enumerate(params):
        ref = ref @ w + b
        if i < num_layers - 1:
            ref = jax.nn.gelu(ref, approximate=False)

    assert out.shape == (batch, output_dim)
    assert jnp.allclose(out, ref, atol=5e-2, rtol=5e-2), \
        float(jnp.max(jnp.abs(out - ref)))
    assert jnp.allclose(out_tiled, ref, atol=5e-2, rtol=5e-2), \
        float(jnp.max(jnp.abs(out_tiled - ref)))

    print("KERNEL_OK")
</pallas_src>

<mosaic_0001>
module attributes {stable_mosaic.version = 11 : i64} {
  func.func @_fused_mlp_kernel(%arg0: i32, %arg1: memref<8x256xbf16, #tpu.memory_space<vmem>>, %arg2: memref<256x256xbf16, #tpu.memory_space<vmem>>, %arg3: memref<1x256xf32, #tpu.memory_space<vmem>>, %arg4: memref<256x256xbf16, #tpu.memory_space<vmem>>, %arg5: memref<1x256xf32, #tpu.memory_space<vmem>>, %arg6: memref<256x256xbf16, #tpu.memory_space<vmem>>, %arg7: memref<1x256xf32, #tpu.memory_space<vmem>>, %arg8: memref<8x256xf32, #tpu.memory_space<vmem>>) attributes {dimension_semantics = [#tpu.dimension_semantics<parallel>], iteration_bounds = array<i64: 1>, scalar_prefetch = 0 : i64, scratch_operands = 0 : i64, tpu.core_type = #tpu.core_type<tc>, window_params = [{transform_indices = @transform_0, window_bounds = array<i64: 8, 256>}, {pipeline_mode = #tpu.pipeline_mode<synchronous>, transform_indices = @transform_1, window_bounds = array<i64: 256, 256>}, {pipeline_mode = #tpu.pipeline_mode<synchronous>, transform_indices = @transform_2, window_bounds = array<i64: 1, 256>}, {pipeline_mode = #tpu.pipeline_mode<synchronous>, transform_indices = @transform_3, window_bounds = array<i64: 256, 256>}, {pipeline_mode = #tpu.pipeline_mode<synchronous>, transform_indices = @transform_4, window_bounds = array<i64: 1, 256>}, {pipeline_mode = #tpu.pipeline_mode<synchronous>, transform_indices = @transform_5, window_bounds = array<i64: 256, 256>}, {pipeline_mode = #tpu.pipeline_mode<synchronous>, transform_indices = @transform_6, window_bounds = array<i64: 1, 256>}, {transform_indices = @transform_7, window_bounds = array<i64: 8, 256>}]} {
    %c0 = arith.constant 0 : index
    %c0_0 = arith.constant 0 : index
    %0 = vector.load %arg1[%c0, %c0_0] : memref<8x256xbf16, #tpu.memory_space<vmem>>, vector<8x256xbf16>
    %c0_1 = arith.constant 0 : index
    %c0_2 = arith.constant 0 : index
    %1 = vector.load %arg2[%c0_1, %c0_2] : memref<256x256xbf16, #tpu.memory_space<vmem>>, vector<256x256xbf16>
    %c0_3 = arith.constant 0 : index
    %c0_4 = arith.constant 0 : index
    %2 = vector.load %arg3[%c0_3, %c0_4] : memref<1x256xf32, #tpu.memory_space<vmem>>, vector<1x256xf32>
    %cst = arith.constant dense<0.000000e+00> : vector<8x256xf32>
    %3 = tpu.matmul %0, %1, %cst {dimension_numbers = #tpu.dot_dimension_numbers<[1], [0], [0], [1], [0, 0, 1, 1], [], []>} : vector<8x256xbf16>, vector<256x256xbf16>, vector<8x256xf32> -> vector<8x256xf32>
    %4 = vector.broadcast %2 : vector<1x256xf32> to vector<8x256xf32>
    %5 = arith.addf %3, %4 : vector<8x256xf32>
    %6 = arith.mulf %5, %5 : vector<8x256xf32>
    %7 = arith.mulf %5, %6 : vector<8x256xf32>
    %cst_5 = arith.constant 4.471500e-02 : f32
    %8 = vector.broadcast %cst_5 : f32 to vector<8x256xf32>
    %9 = arith.mulf %8, %7 : vector<8x256xf32>
    %10 = arith.addf %5, %9 : vector<8x256xf32>
    %cst_6 = arith.constant 0.797884583 : f32
    %11 = vector.broadcast %cst_6 : f32 to vector<8x256xf32>
    %12 = arith.mulf %11, %10 : vector<8x256xf32>
    %13 = math.tanh %12 : vector<8x256xf32>
    %cst_7 = arith.constant 1.000000e+00 : f32
    %14 = vector.broadcast %cst_7 : f32 to vector<8x256xf32>
    %15 = arith.addf %14, %13 : vector<8x256xf32>
    %cst_8 = arith.constant 5.000000e-01 : f32
    %16 = vector.broadcast %cst_8 : f32 to vector<8x256xf32>
    %17 = arith.mulf %16, %15 : vector<8x256xf32>
    %18 = arith.mulf %5, %17 : vector<8x256xf32>
    %19 = arith.truncf %18 : vector<8x256xf32> to vector<8x256xbf16>
    %c0_9 = arith.constant 0 : index
    %c0_10 = arith.constant 0 : index
    %20 = vector.load %arg4[%c0_9, %c0_10] : memref<256x256xbf16, #tpu.memory_space<vmem>>, vector<256x256xbf16>
    %c0_11 = arith.constant 0 : index
    %c0_12 = arith.constant 0 : index
    %21 = vector.load %arg5[%c0_11, %c0_12] : memref<1x256xf32, #tpu.memory_space<vmem>>, vector<1x256xf32>
    %cst_13 = arith.constant dense<0.000000e+00> : vector<8x256xf32>
    %22 = tpu.matmul %19, %20, %cst_13 {dimension_numbers = #tpu.dot_dimension_numbers<[1], [0], [0], [1], [0, 0, 1, 1], [], []>} : vector<8x256xbf16>, vector<256x256xbf16>, vector<8x256xf32> -> vector<8x256xf32>
    %23 = vector.broadcast %21 : vector<1x256xf32> to vector<8x256xf32>
    %24 = arith.addf %22, %23 : vector<8x256xf32>
    %25 = arith.mulf %24, %24 : vector<8x256xf32>
    %26 = arith.mulf %24, %25 : vector<8x256xf32>
    %cst_14 = arith.constant 4.471500e-02 : f32
    %27 = vector.broadcast %cst_14 : f32 to vector<8x256xf32>
    %28 = arith.mulf %27, %26 : vector<8x256xf32>
    %29 = arith.addf %24, %28 : vector<8x256xf32>
    %cst_15 = arith.constant 0.797884583 : f32
    %30 = vector.broadcast %cst_15 : f32 to vector<8x256xf32>
    %31 = arith.mulf %30, %29 : vector<8x256xf32>
    %32 = math.tanh %31 : vector<8x256xf32>
    %cst_16 = arith.constant 1.000000e+00 : f32
    %33 = vector.broadcast %cst_16 : f32 to vector<8x256xf32>
    %34 = arith.addf %33, %32 : vector<8x256xf32>
    %cst_17 = arith.constant 5.000000e-01 : f32
    %35 = vector.broadcast %cst_17 : f32 to vector<8x256xf32>
    %36 = arith.mulf %35, %34 : vector<8x256xf32>
    %37 = arith.mulf %24, %36 : vector<8x256xf32>
    %38 = arith.truncf %37 : vector<8x256xf32> to vector<8x256xbf16>
    %c0_18 = arith.constant 0 : index
    %c0_19 = arith.constant 0 : index
    %39 = vector.load %arg6[%c0_18, %c0_19] : memref<256x256xbf16, #tpu.memory_space<vmem>>, vector<256x256xbf16>
    %c0_20 = arith.constant 0 : index
    %c0_21 = arith.constant 0 : index
    %40 = vector.load %arg7[%c0_20, %c0_21] : memref<1x256xf32, #tpu.memory_space<vmem>>, vector<1x256xf32>
    %cst_22 = arith.constant dense<0.000000e+00> : vector<8x256xf32>
    %41 = tpu.matmul %38, %39, %cst_22 {dimension_numbers = #tpu.dot_dimension_numbers<[1], [0], [0], [1], [0, 0, 1, 1], [], []>} : vector<8x256xbf16>, vector<256x256xbf16>, vector<8x256xf32> -> vector<8x256xf32>
    %42 = vector.broadcast %40 : vector<1x256xf32> to vector<8x256xf32>
    %43 = arith.addf %41, %42 : vector<8x256xf32>
    %c0_23 = arith.constant 0 : index
    %c0_24 = arith.constant 0 : index
    %44 = vector.load %arg8[%c0_23, %c0_24] : memref<8x256xf32, #tpu.memory_space<vmem>>, vector<8x256xf32>
    tpu.vector_store %arg8[%c0_23, %c0_24], %43 {strides = array<i32>} : memref<8x256xf32, #tpu.memory_space<vmem>>, vector<8x256xf32>,
    return
  }
  func.func @transform_0(%arg0: i32) -> (i32, i32) {
    %c0_i32 = arith.constant 0 : i32
    %c0_i32_0 = arith.constant 0 : i32
    return %arg0, %c0_i32 : i32, i32
  }
  func.func @transform_1(%arg0: i32) -> (i32, i32) {
    %c0_i32 = arith.constant 0 : i32
    %c0_i32_0 = arith.constant 0 : i32
    %c0_i32_1 = arith.constant 0 : i32
    return %c0_i32, %c0_i32_0 : i32, i32
  }
  func.func @transform_2(%arg0: i32) -> (i32, i32) {
    %c0_i32 = arith.constant 0 : i32
    %c0_i32_0 = arith.constant 0 : i32
    %c0_i32_1 = arith.constant 0 : i32
    return %c0_i32, %c0_i32_0 : i32, i32
  }
  func.func @transform_3(%arg0: i32) -> (i32, i32) {
    %c0_i32 = arith.constant 0 : i32
    %c0_i32_0 = arith.constant 0 : i32
    %c0_i32_1 = arith.constant 0 : i32
    return %c0_i32, %c0_i32_0 : i32, i32
  }
  func.func @transform_4(%arg0: i32) -> (i32, i32) {
    %c0_i32 = arith.constant 0 : i32
    %c0_i32_0 = arith.constant 0 : i32
    %c0_i32_1 = arith.constant 0 : i32
    return %c0_i32, %c0_i32_0 : i32, i32
  }
  func.func @transform_5(%arg0: i32) -> (i32, i32) {
    %c0_i32 = arith.constant 0 : i32
    %c0_i32_0 = arith.constant 0 : i32
    %c0_i32_1 = arith.constant 0 : i32
    return %c0_i32, %c0_i32_0 : i32, i32
  }
  func.func @transform_6(%arg0: i32) -> (i32, i32) {
    %c0_i32 = arith.constant 0 : i32
    %c0_i32_0 = arith.constant 0 : i32
    %c0_i32_1 = arith.constant 0 : i32
    return %c0_i32, %c0_i32_0 : i32, i32
  }
  func.func @transform_7(%arg0: i32) -> (i32, i32) {
    %c0_i32 = arith.constant 0 : i32
    %c0_i32_0 = arith.constant 0 : i32
    return %arg0, %c0_i32 : i32, i32
  }
}

module attributes {stable_mosaic.version = 11 : i64} {
  func.func @_fused_mlp_kernel(%arg0: i32, %arg1: memref<8x256xbf16, #tpu.memory_space<vmem>>, %arg2: memref<256x256xbf16, #tpu.memory_space<vmem>>, %arg3: memref<1x256xf32, #tpu.memory_space<vmem>>, %arg4: memref<256x256xbf16, #tpu.memory_space<vmem>>, %arg5: memref<1x256xf32, #tpu.memory_space<vmem>>, %arg6: memref<256x256xbf16, #tpu.memory_space<vmem>>, %arg7: memref<1x256xf32, #tpu.memory_space<vmem>>, %arg8: memref<8x256xf32, #tpu.memory_space<vmem>>) attributes {dimension_semantics = [#tpu.dimension_semantics<parallel>], iteration_bounds = array<i64: 1>, scalar_prefetch = 0 : i64, scratch_operands = 0 : i64, tpu.core_type = #tpu.core_type<tc>, window_params = [{transform_indices = @transform_0, window_bounds = array<i64: 8, 256>}, {pipeline_mode = #tpu.pipeline_mode<synchronous>, transform_indices = @transform_1, window_bounds = array<i64: 256, 256>}, {pipeline_mode = #tpu.pipeline_mode<synchronous>, transform_indices = @transform_2, window_bounds = array<i64: 1, 256>}, {pipeline_mode = #tpu.pipeline_mode<synchronous>, transform_indices = @transform_3, window_bounds = array<i64: 256, 256>}, {pipeline_mode = #tpu.pipeline_mode<synchronous>, transform_indices = @transform_4, window_bounds = array<i64: 1, 256>}, {pipeline_mode = #tpu.pipeline_mode<synchronous>, transform_indices = @transform_5, window_bounds = array<i64: 256, 256>}, {pipeline_mode = #tpu.pipeline_mode<synchronous>, transform_indices = @transform_6, window_bounds = array<i64: 1, 256>}, {transform_indices = @transform_7, window_bounds = array<i64: 8, 256>}]} {
    %c0 = arith.constant 0 : index
    %c0_0 = arith.constant 0 : index
    %0 = vector.load %arg1[%c0, %c0_0] : memref<8x256xbf16, #tpu.memory_space<vmem>>, vector<8x256xbf16>
    %c0_1 = arith.constant 0 : index
    %c0_2 = arith.constant 0 : index
    %1 = vector.load %arg2[%c0_1, %c0_2] : memref<256x256xbf16, #tpu.memory_space<vmem>>, vector<256x256xbf16>
    %c0_3 = arith.constant 0 : index
    %c0_4 = arith.constant 0 : index
    %2 = vector.load %arg3[%c0_3, %c0_4] : memref<1x256xf32, #tpu.memory_space<vmem>>, vector<1x256xf32>
    %cst = arith.constant dense<0.000000e+00> : vector<8x256xf32>
    %3 = tpu.matmul %0, %1, %cst {dimension_numbers = #tpu.dot_dimension_numbers<[1], [0], [0], [1], [0, 0, 1, 1], [], []>} : vector<8x256xbf16>, vector<256x256xbf16>, vector<8x256xf32> -> vector<8x256xf32>
    %4 = vector.broadcast %2 : vector<1x256xf32> to vector<8x256xf32>
    %5 = arith.addf %3, %4 : vector<8x256xf32>
    %6 = arith.mulf %5, %5 : vector<8x256xf32>
    %7 = arith.mulf %5, %6 : vector<8x256xf32>
    %cst_5 = arith.constant 4.471500e-02 : f32
    %8 = vector.broadcast %cst_5 : f32 to vector<8x256xf32>
    %9 = arith.mulf %8, %7 : vector<8x256xf32>
    %10 = arith.addf %5, %9 : vector<8x256xf32>
    %cst_6 = arith.constant 0.797884583 : f32
    %11 = vector.broadcast %cst_6 : f32 to vector<8x256xf32>
    %12 = arith.mulf %11, %10 : vector<8x256xf32>
    %13 = math.tanh %12 : vector<8x256xf32>
    %cst_7 = arith.constant 1.000000e+00 : f32
    %14 = vector.broadcast %cst_7 : f32 to vector<8x256xf32>
    %15 = arith.addf %14, %13 : vector<8x256xf32>
    %cst_8 = arith.constant 5.000000e-01 : f32
    %16 = vector.broadcast %cst_8 : f32 to vector<8x256xf32>
    %17 = arith.mulf %16, %15 : vector<8x256xf32>
    %18 = arith.mulf %5, %17 : vector<8x256xf32>
    %19 = arith.truncf %18 : vector<8x256xf32> to vector<8x256xbf16>
    %c0_9 = arith.constant 0 : index
    %c0_10 = arith.constant 0 : index
    %20 = vector.load %arg4[%c0_9, %c0_10] : memref<256x256xbf16, #tpu.memory_space<vmem>>, vector<256x256xbf16>
    %c0_11 = arith.constant 0 : index
    %c0_12 = arith.constant 0 : index
    %21 = vector.load %arg5[%c0_11, %c0_12] : memref<1x256xf32, #tpu.memory_space<vmem>>, vector<1x256xf32>
    %cst_13 = arith.constant dense<0.000000e+00> : vector<8x256xf32>
    %22 = tpu.matmul %19, %20, %cst_13 {dimension_numbers = #tpu.dot_dimension_numbers<[1], [0], [0], [1], [0, 0, 1, 1], [], []>} : vector<8x256xbf16>, vector<256x256xbf16>, vector<8x256xf32> -> vector<8x256xf32>
    %23 = vector.broadcast %21 : vector<1x256xf32> to vector<8x256xf32>
    %24 = arith.addf %22, %23 : vector<8x256xf32>
    %25 = arith.mulf %24, %24 : vector<8x256xf32>
    %26 = arith.mulf %24, %25 : vector<8x256xf32>
    %cst_14 = arith.constant 4.471500e-02 : f32
    %27 = vector.broadcast %cst_14 : f32 to vector<8x256xf32>
    %28 = arith.mulf %27, %26 : vector<8x256xf32>
    %29 = arith.addf %24, %28 : vector<8x256xf32>
    %cst_15 = arith.constant 0.797884583 : f32
    %30 = vector.broadcast %cst_15 : f32 to vector<8x256xf32>
    %31 = arith.mulf %30, %29 : vector<8x256xf32>
    %32 = math.tanh %31 : vector<8x256xf32>
    %cst_16 = arith.constant 1.000000e+00 : f32
    %33 = vector.broadcast %cst_16 : f32 to vector<8x256xf32>
    %34 = arith.addf %33, %32 : vector<8x256xf32>
    %cst_17 = arith.constant 5.000000e-01 : f32
    %35 = vector.broadcast %cst_17 : f32 to vector<8x256xf32>
    %36 = arith.mulf %35, %34 : vector<8x256xf32>
    %37 = arith.mulf %24, %36 : vector<8x256xf32>
    %38 = arith.truncf %37 : vector<8x256xf32> to vector<8x256xbf16>
    %c0_18 = arith.constant 0 : index
    %c0_19 = arith.constant 0 : index
    %39 = vector.load %arg6[%c0_18, %c0_19] : memref<256x256xbf16, #tpu.memory_space<vmem>>, vector<256x256xbf16>
    %c0_20 = arith.constant 0 : index
    %c0_21 = arith.constant 0 : index
    %40 = vector.load %arg7[%c0_20, %c0_21] : memref<1x256xf32, #tpu.memory_space<vmem>>, vector<1x256xf32>
    %cst_22 = arith.constant dense<0.000000e+00> : vector<8x256xf32>
    %41 = tpu.matmul %38, %39, %cst_22 {dimension_numbers = #tpu.dot_dimension_numbers<[1], [0], [0], [1], [0, 0, 1, 1], [], []>} : vector<8x256xbf16>, vector<256x256xbf16>, vector<8x256xf32> -> vector<8x256xf32>
    %42 = vector.broadcast %40 : vector<1x256xf32> to vector<8x256xf32>
    %43 = arith.addf %41, %42 : vector<8x256xf32>
    %c0_23 = arith.constant 0 : index
    %c0_24 = arith.constant 0 : index
    %44 = vector.load %arg8[%c0_23, %c0_24] : memref<8x256xf32, #tpu.memory_space<vmem>>, vector<8x256xf32>
    tpu.vector_store %arg8[%c0_23, %c0_24], %43 {strides = array<i32>} : memref<8x256xf32, #tpu.memory_space<vmem>>, vector<8x256xf32>,
    return
  }
  func.func @transform_0(%arg0: i32) -> (i32, i32) {
    %c0_i32 = arith.constant 0 : i32
    %c0_i32_0 = arith.constant 0 : i32
    return %arg0, %c0_i32 : i32, i32
  }
  func.func @transform_1(%arg0: i32) -> (i32, i32) {
    %c0_i32 = arith.constant 0 : i32
    %c0_i32_0 = arith.constant 0 : i32
    %c0_i32_1 = arith.constant 0 : i32
    return %c0_i32, %c0_i32_0 : i32, i32
  }
  func.func @transform_2(%arg0: i32) -> (i32, i32) {
    %c0_i32 = arith.constant 0 : i32
    %c0_i32_0 = arith.constant 0 : i32
    %c0_i32_1 = arith.constant 0 : i32
    return %c0_i32, %c0_i32_0 : i32, i32
  }
  func.func @transform_3(%arg0: i32) -> (i32, i32) {
    %c0_i32 = arith.constant 0 : i32
    %c0_i32_0 = arith.constant 0 : i32
    %c0_i32_1 = arith.constant 0 : i32
    return %c0_i32, %c0_i32_0 : i32, i32
  }
  func.func @transform_4(%arg0: i32) -> (i32, i32) {
    %c0_i32 = arith.constant 0 : i32
    %c0_i32_0 = arith.constant 0 : i32
    %c0_i32_1 = arith.constant 0 : i32
    return %c0_i32, %c0_i32_0 : i32, i32
  }
  func.func @transform_5(%arg0: i32) -> (i32, i32) {
    %c0_i32 = arith.constant 0 : i32
    %c0_i32_0 = arith.constant 0 : i32
    %c0_i32_1 = arith.constant 0 : i32
    return %c0_i32, %c0_i32_0 : i32, i32
  }
  func.func @transform_6(%arg0: i32) -> (i32, i32) {
    %c0_i32 = arith.constant 0 : i32
    %c0_i32_0 = arith.constant 0 : i32
    %c0_i32_1 = arith.constant 0 : i32
    return %c0_i32, %c0_i32_0 : i32, i32
  }
  func.func @transform_7(%arg0: i32) -> (i32, i32) {
    %c0_i32 = arith.constant 0 : i32
    %c0_i32_0 = arith.constant 0 : i32
    return %arg0, %c0_i32 : i32, i32
  }
}

</mosaic_0001>

<bundles_post_ra>
// kernel: tpu_custom_call.1
= control target key start
LH: loop header
LB: loop body
LE: loop exit
PB: predicated region body
PF: predicated region fallthrough
CT: control target
= control target key end

     0   :  { %12 = vsyncpa [#allocation3], 0  ;;  %s1400_s0 = inlined_call_operand.hbm [shape: bf16[8,256], index: 0, kind: input, shape index: {}]   ;;  %s1401_s1 = inlined_call_operand.hbm [shape: bf16[256,256], index: 1, kind: input, shape index: {}]   ;;  %s1402_s2 = inlined_call_operand.vmem [shape: f32[1,256], index: 2, kind: input, shape index: {}]   ;;  %s1403_s3 = inlined_call_operand.hbm [shape: bf16[256,256], index: 3, kind: input, shape index: {}]   ;;  %s1404_s4 = inlined_call_operand.vmem [shape: f32[1,256], index: 4, kind: input, shape index: {}]   ;;  %s1405_s5 = inlined_call_operand.hbm [shape: bf16[256,256], index: 5, kind: input, shape index: {}]   ;;  %s1406_s6 = inlined_call_operand.vmem [shape: f32[1,256], index: 6, kind: input, shape index: {}]   ;;  %s1407_s7 = inlined_call_operand.hbm [shape: f32[8,256], index: 7, kind: output, shape index: {}]  }
   0x1   :  { %13 = vsyncpa [#allocation6], 0 }
   0x2   :  { %14 = vsyncpa [#allocation9], 0 }
   0x3   :  { %15 = vsyncpa [#allocation4], 0  ;;  %s1259_s24 = smov [#allocation5]   ;;  %s1141_s28 = scalar_lea.hbm %s1401_s1, 4096 }
   0x4   :  { %s31_s25 = sshll.u32 %s1259_s24, 4  ;;  %p1142_p0 = scmp.ne.s32.totalorder %s1401_s1, %s1141_s28  ;;  %s32_s25 = int_to_ptr.vmem [resolvable:$true] %s31_s25 }
   0x5   :  { %p1145_p1 = scmp.lt.u32.totalorder %s1141_s28, %s1401_s1 }
   0x7   :  { %p1147_p2 = pnand %p1145_p1, %p1142_p0 }
   0x9   :  { %1150 = shalt.err (!%p1147_p2)
}
   0xa   :  { %s1151_s10 = scalar_lea.vmem %s32_s25, 4096  ;;  %p1156_p4 = scmp.lt.s32.totalorder %s32_s25, %s32_s25 }
   0xb   :  { %p1152_p3 = scmp.ne.s32.totalorder %s32_s25, %s1151_s10  ;;  %p1157_p5 = scmp.lt.s32.totalorder %s1151_s10, %s1151_s10 }
   0xd   :  { %p1158_p6 = por %p1157_p5, %p1156_p4 }
   0xf   :  { %p1159_p7 = pnand %p1158_p6, %p1152_p3 }
  0x11   :  { %1162 = shalt.err (!%p1159_p7)
}
  0x12   :  { %s1260_s11 = smov 128   ;;  %s1261_s12 = smov 8  }
  0x13   :  { %37 = dma.hbm_to_vmem [thread:$0]  %s1401_s1, 4096, %s32_s25, [#allocation6], %s1260_s11, %s1260_s11, %s1261_s12  }
  0x14   :  { %s1262_s15 = smov [#allocation2]   ;;  %s1263_s17 = smov [#allocation7]  }
  0x15   :  { %s22_s16 = sshll.u32 %s1262_s15, 4  ;;  %s45_s18 = sshll.u32 %s1263_s17, 4  ;;  %s23_s16 = int_to_ptr.vmem [resolvable:$true] %s22_s16  ;;  %s46_s18 = int_to_ptr.vmem [resolvable:$true] %s45_s18 }
  0x16   :  { %s1163_s21 = scalar_lea.hbm %s1400_s0, 128 }
  0x17   :  { %p1164_p8 = scmp.ne.s32.totalorder %s1400_s0, %s1163_s21  ;;  %p1167_p9 = scmp.lt.u32.totalorder %s1163_s21, %s1400_s0 }
  0x19   :  { %p1169_p10 = pnand %p1167_p9, %p1164_p8 }
  0x1b   :  { %1172 = shalt.err (!%p1169_p10)
}
  0x1c   :  { %s1173_s1 = scalar_lea.vmem %s23_s16, 128  ;;  %p1178_p12 = scmp.lt.s32.totalorder %s23_s16, %s23_s16 }
  0x1d   :  { %p1174_p11 = scmp.ne.s32.totalorder %s23_s16, %s1173_s1  ;;  %p1179_p13 = scmp.lt.s32.totalorder %s1173_s1, %s1173_s1 }
  0x1f   :  { %p1180_p0 = por %p1179_p13, %p1178_p12 }
  0x21   :  { %p1181_p1 = pnand %p1180_p0, %p1174_p11 }
  0x23   :  { %1184 = shalt.err (!%p1181_p1)
}
  0x24   :  { %25 = dma.hbm_to_vmem [thread:$0]  %s1400_s0, 128, %s23_s16, [#allocation3]  }
  0x25   :  { %s1185_s30 = scalar_lea.hbm %s1403_s3, 4096 }
  0x26   :  { %p1186_p2 = scmp.ne.s32.totalorder %s1403_s3, %s1185_s30  ;;  %p1189_p3 = scmp.lt.u32.totalorder %s1185_s30, %s1403_s3 }
  0x28   :  { %p1191_p4 = pnand %p1189_p3, %p1186_p2 }
  0x2a   :  { %1194 = shalt.err (!%p1191_p4)
}
  0x2b   :  { %s1195_s14 = scalar_lea.vmem %s46_s18, 4096  ;;  %p1200_p6 = scmp.lt.s32.totalorder %s46_s18, %s46_s18 }
  0x2c   :  { %p1196_p5 = scmp.ne.s32.totalorder %s46_s18, %s1195_s14  ;;  %p1201_p7 = scmp.lt.s32.totalorder %s1195_s14, %s1195_s14 }
  0x2e   :  { %p1202_p8 = por %p1201_p7, %p1200_p6 }
  0x30   :  { %p1203_p9 = pnand %p1202_p8, %p1196_p5 }
  0x32   :  { %1206 = shalt.err (!%p1203_p9)
}
  0x33   :  { %51 = dma.hbm_to_vmem [thread:$0]  %s1403_s3, 4096, %s46_s18, [#allocation6], %s1260_s11, %s1260_s11, %s1261_s12  }
  0x34   :  { %s1264_s16 = smov [#allocation8]   ;;  %s1207_s21 = scalar_lea.hbm %s1405_s5, 4096 }
  0x35   :  { %s59_s17 = sshll.u32 %s1264_s16, 4  ;;  %p1208_p10 = scmp.ne.s32.totalorder %s1405_s5, %s1207_s21  ;;  %s60_s17 = int_to_ptr.vmem [resolvable:$true] %s59_s17 }
  0x36   :  { %p1211_p11 = scmp.lt.u32.totalorder %s1207_s21, %s1405_s5 }
  0x38   :  { %p1213_p12 = pnand %p1211_p11, %p1208_p10 }
  0x3a   :  { %1216 = shalt.err (!%p1213_p12)
}
  0x3b   :  { %s1217_s1 = scalar_lea.vmem %s60_s17, 4096  ;;  %p1222_p0 = scmp.lt.s32.totalorder %s60_s17, %s60_s17 }
  0x3c   :  { %p1218_p13 = scmp.ne.s32.totalorder %s60_s17, %s1217_s1  ;;  %p1223_p1 = scmp.lt.s32.totalorder %s1217_s1, %s1217_s1 }
  0x3e   :  { %p1224_p2 = por %p1223_p1, %p1222_p0 }
  0x40   :  { %p1225_p3 = pnand %p1224_p2, %p1218_p13 }
  0x42   :  { %1228 = shalt.err (!%p1225_p3)
}
  0x43   :  { %65 = dma.hbm_to_vmem [thread:$0]  %s1405_s5, 4096, %s60_s17, [#allocation9], %s1260_s11, %s1260_s11, %s1261_s12  }
  0x44   :  { %1251 = dma.done.wait [#allocation3], 128  }
  0x45   :  { %1252 = vsyncadd [#allocation3], 4294967168 }
  0x46   :  { %1253 = dma.done.wait [#allocation6], 8192  }
  0x47   :  { %1254 = vsyncadd [#allocation6], 4294959104 }
  0x48   :  { %1255 = dma.done.wait [#allocation9], 4096  }
  0x49   :  { %1256 = vsyncadd [#allocation9], 4294963200  ;;  %v987_v0 = vld [vmem:[#allocation5 + $0x4] ss:$8 sps:$4 sm:$0xff]   ;;  %v989_v1 = vld [vmem:[#allocation5] ss:$8 sps:$4 sm:$0xff]  }
  0x4a   :  { %292 = vmatprep.subr.bf16.mxu0 %v987_v0  ;;  %v990_v2 = vld [vmem:[#allocation5 + $0x14] ss:$8 sps:$4 sm:$0xff]   ;;  %v992_v3 = vld [vmem:[#allocation5 + $0x10] ss:$8 sps:$4 sm:$0xff]   ;;  %v993_v4 = vld [vmem:[#allocation5 + $0x24] ss:$8 sps:$4 sm:$0xff]  }
  0x4b   :  { %293 = vmatpush1.bf16.msra.mxu0 %v989_v1  ;;  %v995_v5 = vld [vmem:[#allocation5 + $0x20] ss:$8 sps:$4 sm:$0xff]   ;;  %v996_v6 = vld [vmem:[#allocation5 + $0x34] ss:$8 sps:$4 sm:$0xff]   ;;  %v998_v7 = vld [vmem:[#allocation5 + $0x30] ss:$8 sps:$4 sm:$0xff]  }
  0x4c   :  { %294 = vmatprep.subr.bf16.mxu0 %v990_v2  ;;  %v999_v8 = vld [vmem:[#allocation5 + $0x44] ss:$8 sps:$4 sm:$0xff]   ;;  %v1001_v9 = vld [vmem:[#allocation5 + $0x40] ss:$8 sps:$4 sm:$0xff]   ;;  %v1002_v10 = vld [vmem:[#allocation5 + $0x54] ss:$8 sps:$4 sm:$0xff]  }
  0x4d   :  { %v1004_v11 = vld [vmem:[#allocation5 + $0x50] ss:$8 sps:$4 sm:$0xff]   ;;  %v1005_v12 = vld [vmem:[#allocation5 + $0x64] ss:$8 sps:$4 sm:$0xff]   ;;  %v1007_v13 = vld [vmem:[#allocation5 + $0x60] ss:$8 sps:$4 sm:$0xff]  }
  0x4e   :  { %v1363_v14 = vld [vmem:[#allocation2] sm:$0xff]  ;;  %v1037_v16 = vld [vmem:[#allocation7 + $0x4] ss:$8 sps:$4 sm:$0xff]   ;;  %v1039_v17 = vld [vmem:[#allocation7] ss:$8 sps:$4 sm:$0xff]   ;;  %s1265_s27 = smov [#allocation10]  }
  0x4f   :  { %295 = vmatpush1.bf16.msra.mxu0 %v992_v3  ;;  %v883_v15 = vcombine.high %v1363_v14, %v1363_v14  ;;  %v1040_v18 = vld [vmem:[#allocation7 + $0x14] ss:$8 sps:$4 sm:$0xff]   ;;  %557 = vmatprep.subr.bf16.mxu1 %v1037_v16  ;;  %v1010_v20 = vld [vmem:[#allocation5 + $0x70] ss:$8 sps:$4 sm:$0xff]   ;;  %v1043_v22 = vld [vmem:[#allocation7 + $0x24] ss:$8 sps:$4 sm:$0xff]   ;;  %v882_v50 = vcombine.low %v1363_v14, %v1363_v14 }
  0x50   :  { %296 = vmatprep.subr.bf16.mxu0 %v993_v4  ;;  %v1008_v19 = vld [vmem:[#allocation5 + $0x74] ss:$8 sps:$4 sm:$0xff]   ;;  %558 = vmatpush1.bf16.msra.mxu1 %v1039_v17  ;;  %v1042_v21 = vld [vmem:[#allocation7 + $0x10] ss:$8 sps:$4 sm:$0xff]   ;;  %v1011_v23 = vld [vmem:[#allocation5 + $0x84] ss:$8 sps:$4 sm:$0xff]  }
  0x51   :  { %324 = vmatprep.mubr.bf16.mxu0 %v883_v15  ;;  %559 = vmatprep.subr.bf16.mxu1 %v1040_v18  ;;  %v1013_v24 = vld [vmem:[#allocation5 + $0x80] ss:$8 sps:$4 sm:$0xff]   ;;  %v1046_v26 = vld [vmem:[#allocation7 + $0x34] ss:$8 sps:$4 sm:$0xff]   ;;  %v1048_v28 = vld [vmem:[#allocation7 + $0x30] ss:$8 sps:$4 sm:$0xff]  }
  0x52   :  { %v1045_v25 = vld [vmem:[#allocation7 + $0x20] ss:$8 sps:$4 sm:$0xff]   ;;  %v1014_v27 = vld [vmem:[#allocation5 + $0x94] ss:$8 sps:$4 sm:$0xff]   ;;  %v1016_v29 = vld [vmem:[#allocation5 + $0x90] ss:$8 sps:$4 sm:$0xff]  }
  0x53   :  { %297 = vmatpush1.bf16.msra.mxu0 %v995_v5  ;;  %v1049_v30 = vld [vmem:[#allocation7 + $0x44] ss:$8 sps:$4 sm:$0xff]   ;;  %v1051_v32 = vld [vmem:[#allocation7 + $0x40] ss:$8 sps:$4 sm:$0xff]   ;;  %v1052_v34 = vld [vmem:[#allocation7 + $0x54] ss:$8 sps:$4 sm:$0xff]  }
  0x54   :  { %298 = vmatprep.subr.bf16.mxu0 %v996_v6  ;;  %560 = vmatpush1.bf16.msra.mxu1 %v1042_v21  ;;  %v1017_v31 = vld [vmem:[#allocation5 + $0xa4] ss:$8 sps:$4 sm:$0xff]   ;;  %v1019_v33 = vld [vmem:[#allocation5 + $0xa0] ss:$8 sps:$4 sm:$0xff]   ;;  %v1020_v35 = vld [vmem:[#allocation5 + $0xb4] ss:$8 sps:$4 sm:$0xff]  }
  0x55   :  { %561 = vmatprep.subr.bf16.mxu1 %v1043_v22  ;;  %v1054_v36 = vld [vmem:[#allocation7 + $0x50] ss:$8 sps:$4 sm:$0xff]   ;;  %v1055_v38 = vld [vmem:[#allocation7 + $0x64] ss:$8 sps:$4 sm:$0xff]   ;;  %v1057_v40 = vld [vmem:[#allocation7 + $0x60] ss:$8 sps:$4 sm:$0xff]  }
  0x56   :  { %v1022_v37 = vld [vmem:[#allocation5 + $0xb0] ss:$8 sps:$4 sm:$0xff]   ;;  %v1023_v39 = vld [vmem:[#allocation5 + $0xc4] ss:$8 sps:$4 sm:$0xff]   ;;  %v1025_v41 = vld [vmem:[#allocation5 + $0xc0] ss:$8 sps:$4 sm:$0xff]  }
  0x57   :  { %299 = vmatpush1.bf16.msra.mxu0 %v998_v7  ;;  %v1058_v42 = vld [vmem:[#allocation7 + $0x74] ss:$8 sps:$4 sm:$0xff]   ;;  %v1060_v44 = vld [vmem:[#allocation7 + $0x70] ss:$8 sps:$4 sm:$0xff]   ;;  %v1029_v46 = vld [vmem:[#allocation5 + $0xe4] ss:$8 sps:$4 sm:$0xff]  }
  0x58   :  { %300 = vmatprep.subr.bf16.mxu0 %v999_v8  ;;  %562 = vmatpush1.bf16.msra.mxu1 %v1045_v25  ;;  %v1026_v43 = vld [vmem:[#allocation5 + $0xd4] ss:$8 sps:$4 sm:$0xff]   ;;  %v1028_v45 = vld [vmem:[#allocation5 + $0xd0] ss:$8 sps:$4 sm:$0xff]   ;;  %v1031_v47 = vld [vmem:[#allocation5 + $0xe0] ss:$8 sps:$4 sm:$0xff]  }
  0x59   :  { %563 = vmatprep.subr.bf16.mxu1 %v1046_v26  ;;  %v1032_v48 = vld [vmem:[#allocation5 + $0xf4] ss:$8 sps:$4 sm:$0xff]   ;;  %v1034_v49 = vld [vmem:[#allocation5 + $0xf0] ss:$8 sps:$4 sm:$0xff]   ;;  %v1061_v51 = vld [vmem:[#allocation7 + $0x84] ss:$8 sps:$4 sm:$0xff]  }
  0x5a   :  { %v1063_v52 = vld [vmem:[#allocation7 + $0x80] ss:$8 sps:$4 sm:$0xff]   ;;  %v1064_v53 = vld [vmem:[#allocation7 + $0x94] ss:$8 sps:$4 sm:$0xff]   ;;  %v1066_v54 = vld [vmem:[#allocation7 + $0x90] ss:$8 sps:$4 sm:$0xff]  }
  0x5b   :  { %301 = vmatpush1.bf16.msra.mxu0 %v1001_v9  ;;  %v1067_v55 = vld [vmem:[#allocation7 + $0xa4] ss:$8 sps:$4 sm:$0xff]   ;;  %v1069_v56 = vld [vmem:[#allocation7 + $0xa0] ss:$8 sps:$4 sm:$0xff]   ;;  %v1070_v57 = vld [vmem:[#allocation7 + $0xb4] ss:$8 sps:$4 sm:$0xff]  }
  0x5c   :  { %302 = vmatprep.subr.bf16.mxu0 %v1002_v10  ;;  %564 = vmatpush1.bf16.msra.mxu1 %v1048_v28  ;;  %v1072_v58 = vld [vmem:[#allocation7 + $0xb0] ss:$8 sps:$4 sm:$0xff]   ;;  %v1073_v59 = vld [vmem:[#allocation7 + $0xc4] ss:$8 sps:$4 sm:$0xff]   ;;  %v1075_v60 = vld [vmem:[#allocation7 + $0xc0] ss:$8 sps:$4 sm:$0xff]  }
  0x5d   :  { %565 = vmatprep.subr.bf16.mxu1 %v1049_v30  ;;  %v1076_v61 = vld [vmem:[#allocation7 + $0xd4] ss:$8 sps:$4 sm:$0xff]   ;;  %v1078_v62 = vld [vmem:[#allocation7 + $0xd0] ss:$8 sps:$4 sm:$0xff]   ;;  %v1079_v63 = vld [vmem:[#allocation7 + $0xe4] ss:$8 sps:$4 sm:$0xff]  }
  0x5e   :  { %v1081_v0 = vld [vmem:[#allocation7 + $0xe0] ss:$8 sps:$4 sm:$0xff]   ;;  %v1082_v1 = vld [vmem:[#allocation7 + $0xf4] ss:$8 sps:$4 sm:$0xff]   ;;  %v1084_v2 = vld [vmem:[#allocation7 + $0xf0] ss:$8 sps:$4 sm:$0xff]  }
  0x5f   :  { %303 = vmatpush1.bf16.msra.mxu0 %v1004_v11  ;;  %v1085_v3 = vld [vmem:[#allocation8] ss:$8 sps:$4 sm:$0xff]   ;;  %v1087_v4 = vld [vmem:[#allocation8 + $0x4] ss:$8 sps:$4 sm:$0xff]   ;;  %v1090_v5 = vld [vmem:[#allocation8 + $0x14] ss:$8 sps:$4 sm:$0xff]  }
  0x60   :  { %304 = vmatprep.subr.bf16.mxu0 %v1005_v12  ;;  %566 = vmatpush1.bf16.msra.mxu1 %v1051_v32  ;;  %v1088_v6 = vld [vmem:[#allocation8 + $0x10] ss:$8 sps:$4 sm:$0xff]   ;;  %v1093_v7 = vld [vmem:[#allocation8 + $0x24] ss:$8 sps:$4 sm:$0xff]   ;;  %v1091_v8 = vld [vmem:[#allocation8 + $0x20] ss:$8 sps:$4 sm:$0xff]  }
  0x61   :  { %567 = vmatprep.subr.bf16.mxu1 %v1052_v34  ;;  %v1096_v9 = vld [vmem:[#allocation8 + $0x34] ss:$8 sps:$4 sm:$0xff]   ;;  %v1094_v10 = vld [vmem:[#allocation8 + $0x30] ss:$8 sps:$4 sm:$0xff]   ;;  %v1099_v11 = vld [vmem:[#allocation8 + $0x44] ss:$8 sps:$4 sm:$0xff]  }
  0x62   :  { %v1097_v12 = vld [vmem:[#allocation8 + $0x40] ss:$8 sps:$4 sm:$0xff]   ;;  %v1100_v14 = vld [vmem:[#allocation8 + $0x50] ss:$8 sps:$4 sm:$0xff]   ;;  %v1105_v15 = vld [vmem:[#allocation8 + $0x64] ss:$8 sps:$4 sm:$0xff]  }
  0x63   :  { %305 = vmatpush1.bf16.msra.mxu0 %v1007_v13  ;;  %v1102_v13 = vld [vmem:[#allocation8 + $0x54] ss:$8 sps:$4 sm:$0xff]   ;;  %v1103_v16 = vld [vmem:[#allocation8 + $0x60] ss:$8 sps:$4 sm:$0xff]   ;;  %v1106_v18 = vld [vmem:[#allocation8 + $0x70] ss:$8 sps:$4 sm:$0xff]  }
  0x64   :  { %306 = vmatprep.subr.bf16.mxu0 %v1008_v19  ;;  %568 = vmatpush1.bf16.msra.mxu1 %v1054_v36  ;;  %v1108_v17 = vld [vmem:[#allocation8 + $0x74] ss:$8 sps:$4 sm:$0xff]   ;;  %v115_v19 = vlaneseq  ;;  %v113_v22 = vld [vmem:[%s1402_s2] sm:$0x3]  ;;  %s871_s28 = sshll.u32 %s1265_s27, 4  ;;  %s872_s28 = int_to_ptr.vmem [resolvable:$true] %s871_s28 }
  0x65   :  { %569 = vmatprep.subr.bf16.mxu1 %v1055_v38  ;;  %s1229_s29 = scalar_lea.vmem %s872_s28, 256  ;;  %p1234_p5 = scmp.lt.s32.totalorder %s872_s28, %s872_s28 }
  0x66   :  { %p1230_p4 = scmp.ne.s32.totalorder %s872_s28, %s1229_s29  ;;  %p1235_p6 = scmp.lt.s32.totalorder %s1229_s29, %s1229_s29 }
  0x67   :  { %307 = vmatpush1.bf16.msra.mxu0 %v1010_v20  ;;  %v116_v20 = vshrl.u32 %v115_v19, 7 }
  0x68   :  { %308 = vmatprep.subr.bf16.mxu0 %v1011_v23  ;;  %570 = vmatpush1.bf16.msra.mxu1 %v1057_v40  ;;  %p1236_p7 = por %p1235_p6, %p1234_p5 }
  0x69   :  { %571 = vmatprep.subr.bf16.mxu1 %v1058_v42  ;;  %v1369_v21 = vsub.s32 0, %v116_v20  ;;  %v1374_v23 = vsub.s32 1, %v116_v20 }
  0x6a   :  { %p1237_p8 = pnand %p1236_p7, %p1230_p4 }
  0x6b   :  { %309 = vmatpush1.bf16.msra.mxu0 %v1013_v24  ;;  %v118_v24 = vrot.slane %v113_v22, %v1369_v21  ;;  %v122_v25 = vrot.slane %v113_v22, %v1374_v23 }
  0x6c   :  { %310 = vmatprep.subr.bf16.mxu0 %v1014_v27  ;;  %572 = vmatpush1.bf16.msra.mxu1 %v1060_v44 }
  0x6d   :  { %573 = vmatprep.subr.bf16.mxu1 %v1061_v51 }
  0x6f   :  { %311 = vmatpush1.bf16.msra.mxu0 %v1016_v29 }
  0x70   :  { %312 = vmatprep.subr.bf16.mxu0 %v1017_v31  ;;  %574 = vmatpush1.bf16.msra.mxu1 %v1063_v52  ;;  %v1111_v52 = vld [vmem:[#allocation8 + $0x84] ss:$8 sps:$4 sm:$0xff]  }
  0x71   :  { %575 = vmatprep.subr.bf16.mxu1 %v1064_v53  ;;  %v1109_v53 = vld [vmem:[#allocation8 + $0x80] ss:$8 sps:$4 sm:$0xff]  }
  0x73   :  { %313 = vmatpush1.bf16.msra.mxu0 %v1019_v33 }
  0x74   :  { %314 = vmatprep.subr.bf16.mxu0 %v1020_v35  ;;  %576 = vmatpush1.bf16.msra.mxu1 %v1066_v54  ;;  %v1114_v54 = vld [vmem:[#allocation8 + $0x94] ss:$8 sps:$4 sm:$0xff]  }
  0x75   :  { %577 = vmatprep.subr.bf16.mxu1 %v1067_v55  ;;  %v1112_v55 = vld [vmem:[#allocation8 + $0x90] ss:$8 sps:$4 sm:$0xff]  }
  0x77   :  { %315 = vmatpush1.bf16.msra.mxu0 %v1022_v37 }
  0x78   :  { %316 = vmatprep.subr.bf16.mxu0 %v1023_v39  ;;  %578 = vmatpush1.bf16.msra.mxu1 %v1069_v56  ;;  %v1117_v56 = vld [vmem:[#allocation8 + $0xa4] ss:$8 sps:$4 sm:$0xff]  }
  0x79   :  { %579 = vmatprep.subr.bf16.mxu1 %v1070_v57  ;;  %v1115_v57 = vld [vmem:[#allocation8 + $0xa0] ss:$8 sps:$4 sm:$0xff]  }
  0x7b   :  { %317 = vmatpush1.bf16.msra.mxu0 %v1025_v41 }
  0x7c   :  { %318 = vmatprep.subr.bf16.mxu0 %v1026_v43  ;;  %580 = vmatpush1.bf16.msra.mxu1 %v1072_v58  ;;  %v1120_v58 = vld [vmem:[#allocation8 + $0xb4] ss:$8 sps:$4 sm:$0xff]  }
  0x7d   :  { %581 = vmatprep.subr.bf16.mxu1 %v1073_v59  ;;  %v1118_v59 = vld [vmem:[#allocation8 + $0xb0] ss:$8 sps:$4 sm:$0xff]  }
  0x7f   :  { %319 = vmatpush1.bf16.msra.mxu0 %v1028_v45 }
  0x80   :  { %320 = vmatprep.subr.bf16.mxu0 %v1029_v46  ;;  %582 = vmatpush1.bf16.msra.mxu1 %v1075_v60  ;;  %v1123_v60 = vld [vmem:[#allocation8 + $0xc4] ss:$8 sps:$4 sm:$0xff]  }
  0x81   :  { %583 = vmatprep.subr.bf16.mxu1 %v1076_v61  ;;  %v1121_v61 = vld [vmem:[#allocation8 + $0xc0] ss:$8 sps:$4 sm:$0xff]  }
  0x83   :  { %321 = vmatpush1.bf16.msra.mxu0 %v1031_v47 }
  0x84   :  { %322 = vmatprep.subr.bf16.mxu0 %v1032_v48  ;;  %584 = vmatpush1.bf16.msra.mxu1 %v1078_v62  ;;  %v1126_v62 = vld [vmem:[#allocation8 + $0xd4] ss:$8 sps:$4 sm:$0xff]  }
  0x85   :  { %585 = vmatprep.subr.bf16.mxu1 %v1079_v63  ;;  %v1124_v63 = vld [vmem:[#allocation8 + $0xd0] ss:$8 sps:$4 sm:$0xff]  }
  0x87   :  { %323 = vmatpush1.bf16.msra.mxu0 %v1034_v49 }
  0x88   :  { %586 = vmatpush1.bf16.msra.mxu1 %v1081_v0  ;;  %822 = vmatprep.subr.bf16.mxu0 %v1087_v4  ;;  %v1129_v0 = vld [vmem:[#allocation8 + $0xe4] ss:$8 sps:$4 sm:$0xff]   ;;  %v385_v4 = vld [vmem:[%s1404_s4] sm:$0x3] }
  0x89   :  { %587 = vmatprep.subr.bf16.mxu1 %v1082_v1  ;;  %v1127_v1 = vld [vmem:[#allocation8 + $0xe0] ss:$8 sps:$4 sm:$0xff]  }
  0x8a   :  { %325 = vmatmul.mubr.bf16.vlgmr.msra.gmra.mrb[0].mxu0 %v882_v50 }
  0x8b   :  { %823 = vmatpush1.bf16.msra.mxu0 %v1085_v3  ;;  %v1130_v3 = vld [vmem:[#allocation8 + $0xf0] ss:$8 sps:$4 sm:$0xff]  }
  0x8c   :  { %588 = vmatpush1.bf16.msra.mxu1 %v1084_v2  ;;  %824 = vmatprep.subr.bf16.mxu0 %v1090_v5  ;;  %v1132_v2 = vld [vmem:[#allocation8 + $0xf4] ss:$8 sps:$4 sm:$0xff]   ;;  %v390_v5 = vrot.slane %v385_v4, %v1369_v21 }
  0x8f   :  { %825 = vmatpush1.bf16.msra.mxu0 %v1088_v6  ;;  %v394_v6 = vrot.slane %v385_v4, %v1374_v23 }
  0x90   :  { %826 = vmatprep.subr.bf16.mxu0 %v1093_v7 }
  0x93   :  { %827 = vmatpush1.bf16.msra.mxu0 %v1091_v8 }
  0x94   :  { %828 = vmatprep.subr.bf16.mxu0 %v1096_v9 }
  0x97   :  { %829 = vmatpush1.bf16.msra.mxu0 %v1094_v10 }
  0x98   :  { %830 = vmatprep.subr.bf16.mxu0 %v1099_v11 }
  0x9b   :  { %831 = vmatpush1.bf16.msra.mxu0 %v1097_v12 }
  0x9c   :  { %832 = vmatprep.subr.bf16.mxu0 %v1102_v13 }
  0x9f   :  { %833 = vmatpush1.bf16.msra.mxu0 %v1100_v14 }
  0xa0   :  { %834 = vmatprep.subr.bf16.mxu0 %v1105_v15 }
  0xa3   :  { %835 = vmatpush1.bf16.msra.mxu0 %v1103_v16 }
  0xa4   :  { %836 = vmatprep.subr.bf16.mxu0 %v1108_v17 }
  0xa7   :  { %837 = vmatpush1.bf16.msra.mxu0 %v1106_v18 }
  0xa8   :  { %838 = vmatprep.subr.bf16.mxu0 %v1111_v52 }
  0xab   :  { %839 = vmatpush1.bf16.msra.mxu0 %v1109_v53 }
  0xac   :  { %840 = vmatprep.subr.bf16.mxu0 %v1114_v54 }
  0xaf   :  { %841 = vmatpush1.bf16.msra.mxu0 %v1112_v55 }
  0xb0   :  { %842 = vmatprep.subr.bf16.mxu0 %v1117_v56 }
  0xb3   :  { %843 = vmatpush1.bf16.msra.mxu0 %v1115_v57 }
  0xb4   :  { %844 = vmatprep.subr.bf16.mxu0 %v1120_v58 }
  0xb7   :  { %845 = vmatpush1.bf16.msra.mxu0 %v1118_v59 }
  0xb8   :  { %846 = vmatprep.subr.bf16.mxu0 %v1123_v60 }
  0xbb   :  { %847 = vmatpush1.bf16.msra.mxu0 %v1121_v61 }
  0xbc   :  { %848 = vmatprep.subr.bf16.mxu0 %v1126_v62 }
  0xbf   :  { %849 = vmatpush1.bf16.msra.mxu0 %v1124_v63 }
  0xc0   :  { %850 = vmatprep.subr.bf16.mxu0 %v1129_v0 }
  0xc3   :  { %851 = vmatpush1.bf16.msra.mxu0 %v1127_v1 }
  0xc4   :  { %852 = vmatprep.subr.bf16.mxu0 %v1132_v2 }
  0xc7   :  { %853 = vmatpush1.bf16.msra.mxu0 %v1130_v3 }
 0x15d   :  { %v326_v26 = vpop.f32.mrb[0].mxu0 }
 0x15e   :  { %v327_v27 = vadd.f32 %v326_v26, %v118_v24  ;;  %v328_v28 = vpop.f32.mrb[1].mxu0 }
 0x15f   :  { %v329_v29 = vadd.f32 %v328_v28, %v122_v25  ;;  %v330_v30 = vpop.f32.mrb[2].mxu0 }
 0x160   :  { %v333_v31 = vmul.f32 %v327_v27, %v327_v27  ;;  %v331_v32 = vpop.f32.mrb[3].mxu0 }
 0x161   :  { %v334_v33 = vmul.f32 %v329_v29, %v329_v29 }
 0x162   :  { %v335_v34 = vmul.f32 %v333_v31, %v327_v27 }
 0x163   :  { %v336_v35 = vmul.f32 %v334_v33, %v329_v29 }
 0x164   :  { %v337_v36 = vmul.f32 0.044715, %v335_v34 }
 0x165   :  { %v338_v37 = vmul.f32 0.044715, %v336_v35  ;;  %v650_v35 = vld [vmem:[%s1406_s6] sm:$0x3] }
 0x166   :  { %v339_v38 = vadd.f32 %v337_v36, %v327_v27  ;;  %v655_v36 = vrot.slane %v650_v35, %v1369_v21 }
 0x167   :  { %v340_v39 = vadd.f32 %v338_v37, %v329_v29  ;;  %v659_v37 = vrot.slane %v650_v35, %v1374_v23 }
 0x168   :  { %v341_v40 = vmul.f32 0.7978846, %v339_v38 }
 0x169   :  { %v342_v41 = vmul.f32 0.7978846, %v340_v39 }
 0x16a   :  { %1133 = vtanh.f32 %v341_v40 }
 0x16b   :  { %1135 = vtanh.f32 %v342_v41 }
 0x174   :  { %v1134_v42 = vpop.eup %1133 }
 0x175   :  { %v1136_v43 = vpop.eup %1135  ;;  %v345_v44 = vadd.f32 1.0, %v1134_v42 }
 0x176   :  { %v346_v45 = vadd.f32 1.0, %v1136_v43 }
 0x177   :  { %v347_v46 = vmul.f32 0.5, %v345_v44 }
 0x178   :  { %v348_v47 = vmul.f32 0.5, %v346_v45 }
 0x179   :  { %v349_v48 = vmul.f32 %v347_v46, %v327_v27 }
 0x17a   :  { %v350_v49 = vmul.f32 %v348_v47, %v329_v29 }
 0x17b   :  { %v351_v51 = vpack.c.bf16 %v349_v48, %v349_v48 }
 0x17c   :  { %v352_v50 = vpack.c.bf16 %v350_v49, %v350_v49 }
 0x17e   :  { %589 = vmatprep.mubr.bf16.mxu1 %v352_v50 }
 0x17f   :  { %590 = vmatmul.mubr.bf16.vlgmr.msra.gmra.mrb[0].mxu1 %v351_v51 }
 0x252   :  { %v591_v7 = vpop.f32.mrb[0].mxu1 }
 0x253   :  { %v592_v8 = vadd.f32 %v591_v7, %v390_v5  ;;  %v593_v9 = vpop.f32.mrb[1].mxu1 }
 0x254   :  { %v594_v10 = vadd.f32 %v593_v9, %v394_v6  ;;  %v595_v11 = vpop.f32.mrb[2].mxu1 }
 0x255   :  { %v598_v12 = vmul.f32 %v592_v8, %v592_v8  ;;  %v596_v13 = vpop.f32.mrb[3].mxu1 }
 0x256   :  { %v599_v14 = vmul.f32 %v594_v10, %v594_v10 }
 0x257   :  { %v600_v15 = vmul.f32 %v598_v12, %v592_v8 }
 0x258   :  { %v601_v16 = vmul.f32 %v599_v14, %v594_v10 }
 0x259   :  { %v602_v17 = vmul.f32 0.044715, %v600_v15 }
 0x25a   :  { %v603_v18 = vmul.f32 0.044715, %v601_v16 }
 0x25b   :  { %v604_v19 = vadd.f32 %v602_v17, %v592_v8 }
 0x25c   :  { %v605_v20 = vadd.f32 %v603_v18, %v594_v10 }
 0x25d   :  { %v606_v22 = vmul.f32 0.7978846, %v604_v19 }
 0x25e   :  { %v607_v24 = vmul.f32 0.7978846, %v605_v20 }
 0x25f   :  { %1137 = vtanh.f32 %v606_v22 }
 0x260   :  { %1139 = vtanh.f32 %v607_v24 }
 0x269   :  { %v1138_v25 = vpop.eup %1137 }
 0x26a   :  { %v1140_v26 = vpop.eup %1139  ;;  %v610_v27 = vadd.f32 1.0, %v1138_v25 }
 0x26b   :  { %v611_v28 = vadd.f32 1.0, %v1140_v26 }
 0x26c   :  { %v612_v29 = vmul.f32 0.5, %v610_v27 }
 0x26d   :  { %v613_v30 = vmul.f32 0.5, %v611_v28 }
 0x26e   :  { %v614_v31 = vmul.f32 %v612_v29, %v592_v8 }
 0x26f   :  { %v615_v32 = vmul.f32 %v613_v30, %v594_v10 }
 0x270   :  { %v616_v34 = vpack.c.bf16 %v614_v31, %v614_v31 }
 0x271   :  { %v617_v33 = vpack.c.bf16 %v615_v32, %v615_v32 }
 0x273   :  { %854 = vmatprep.mubr.bf16.mxu0 %v617_v33 }
 0x274   :  { %855 = vmatmul.mubr.bf16.vlgmr.msra.gmra.mrb[4].mxu0 %v616_v34 }
 0x347   :  { %v856_v38 = vpop.f32.mrb[4].mxu0 }
 0x348   :  { %v857_v39 = vadd.f32 %v856_v38, %v655_v36  ;;  %v858_v40 = vpop.f32.mrb[5].mxu0 }
 0x349   :  { %v859_v41 = vadd.f32 %v858_v40, %v659_v37  ;;  %v860_v42 = vpop.f32.mrb[6].mxu0 }
 0x34a   :  { %863 = vst [vmem:[#allocation10] sm:$0xff] %v857_v39  ;;  %v861_v43 = vpop.f32.mrb[7].mxu0 }
 0x34b   :  { %864 = vst [vmem:[#allocation10 + $0x8] sm:$0xff] %v859_v41 }
 0x34c   :  { %1240 = shalt.err (!%p1237_p8)
}
 0x34d   :  { %s1241_s8 = scalar_lea.hbm %s1407_s7, 256 }
 0x34e   :  { %p1242_p9 = scmp.ne.s32.totalorder %s1407_s7, %s1241_s8  ;;  %p1245_p10 = scmp.lt.u32.totalorder %s1241_s8, %s1407_s7 }
 0x350   :  { %p1247_p11 = pnand %p1245_p10, %p1242_p9 }
 0x352   :  { %1250 = shalt.err (!%p1247_p11)
}
 0x353   :  { %874 = dma.vmem_to_hbm [thread:$0]  %s872_s28, 256, %s1407_s7, [#allocation4]  }
 0x354   :  { %1257 = dma.done.wait [#allocation4], 256  }
 0x355   :  { %1258 = vsyncadd [#allocation4], 4294967040 }
 0x356   :  { %878 = vsyncpa [#allocation3], 1 }
 0x357   :  { %879 = vsyncpa [#allocation6], 1 }
 0x358   :  { %880 = vsyncpa [#allocation9], 1 }
 0x359   :  { %881 = vsyncpa [#allocation4], 1 }

// kernel: tpu_custom_call.1
= control target key start
LH: loop header
LB: loop body
LE: loop exit
PB: predicated region body
PF: predicated region fallthrough
CT: control target
= control target key end

     0   :  { %12 = vsyncpa [#allocation3], 0  ;;  %s1400_s0 = inlined_call_operand.hbm [shape: bf16[8,256], index: 0, kind: input, shape index: {}]   ;;  %s1401_s1 = inlined_call_operand.hbm [shape: bf16[256,256], index: 1, kind: input, shape index: {}]   ;;  %s1402_s2 = inlined_call_operand.vmem [shape: f32[1,256], index: 2, kind: input, shape index: {}]   ;;  %s1403_s3 = inlined_call_operand.hbm [shape: bf16[256,256], index: 3, kind: input, shape index: {}]   ;;  %s1404_s4 = inlined_call_operand.vmem [shape: f32[1,256], index: 4, kind: input, shape index: {}]   ;;  %s1405_s5 = inlined_call_operand.hbm [shape: bf16[256,256], index: 5, kind: input, shape index: {}]   ;;  %s1406_s6 = inlined_call_operand.vmem [shape: f32[1,256], index: 6, kind: input, shape index: {}]   ;;  %s1407_s7 = inlined_call_operand.hbm [shape: f32[8,256], index: 7, kind: output, shape index: {}]  }
   0x1   :  { %13 = vsyncpa [#allocation6], 0 }
   0x2   :  { %14 = vsyncpa [#allocation9], 0 }
   0x3   :  { %15 = vsyncpa [#allocation4], 0  ;;  %s1259_s24 = smov [#allocation5]   ;;  %s1141_s28 = scalar_lea.hbm %s1401_s1, 4096 }
   0x4   :  { %s31_s25 = sshll.u32 %s1259_s24, 4  ;;  %p1142_p0 = scmp.ne.s32.totalorder %s1401_s1, %s1141_s28  ;;  %s32_s25 = int_to_ptr.vmem [resolvable:$true] %s31_s25 }
   0x5   :  { %p1145_p1 = scmp.lt.u32.totalorder %s1141_s28, %s1401_s1 }
   0x7   :  { %p1147_p2 = pnand %p1145_p1, %p1142_p0 }
   0x9   :  { %1150 = shalt.err (!%p1147_p2)
}
   0xa   :  { %s1151_s10 = scalar_lea.vmem %s32_s25, 4096  ;;  %p1156_p4 = scmp.lt.s32.totalorder %s32_s25, %s32_s25 }
   0xb   :  { %p1152_p3 = scmp.ne.s32.totalorder %s32_s25, %s1151_s10  ;;  %p1157_p5 = scmp.lt.s32.totalorder %s1151_s10, %s1151_s10 }
   0xd   :  { %p1158_p6 = por %p1157_p5, %p1156_p4 }
   0xf   :  { %p1159_p7 = pnand %p1158_p6, %p1152_p3 }
  0x11   :  { %1162 = shalt.err (!%p1159_p7)
}
  0x12   :  { %s1260_s11 = smov 128   ;;  %s1261_s12 = smov 8  }
  0x13   :  { %37 = dma.hbm_to_vmem [thread:$0]  %s1401_s1, 4096, %s32_s25, [#allocation6], %s1260_s11, %s1260_s11, %s1261_s12  }
  0x14   :  { %s1262_s15 = smov [#allocation2]   ;;  %s1263_s17 = smov [#allocation7]  }
  0x15   :  { %s22_s16 = sshll.u32 %s1262_s15, 4  ;;  %s45_s18 = sshll.u32 %s1263_s17, 4  ;;  %s23_s16 = int_to_ptr.vmem [resolvable:$true] %s22_s16  ;;  %s46_s18 = int_to_ptr.vmem [resolvable:$true] %s45_s18 }
  0x16   :  { %s1163_s21 = scalar_lea.hbm %s1400_s0, 128 }
  0x17   :  { %p1164_p8 = scmp.ne.s32.totalorder %s1400_s0, %s1163_s21  ;;  %p1167_p9 = scmp.lt.u32.totalorder %s1163_s21, %s1400_s0 }
  0x19   :  { %p1169_p10 = pnand %p1167_p9, %p1164_p8 }
  0x1b   :  { %1172 = shalt.err (!%p1169_p10)
}
  0x1c   :  { %s1173_s1 = scalar_lea.vmem %s23_s16, 128  ;;  %p1178_p12 = scmp.lt.s32.totalorder %s23_s16, %s23_s16 }
  0x1d   :  { %p1174_p11 = scmp.ne.s32.totalorder %s23_s16, %s1173_s1  ;;  %p1179_p13 = scmp.lt.s32.totalorder %s1173_s1, %s1173_s1 }
  0x1f   :  { %p1180_p0 = por %p1179_p13, %p1178_p12 }
  0x21   :  { %p1181_p1 = pnand %p1180_p0, %p1174_p11 }
  0x23   :  { %1184 = shalt.err (!%p1181_p1)
}
  0x24   :  { %25 = dma.hbm_to_vmem [thread:$0]  %s1400_s0, 128, %s23_s16, [#allocation3]  }
  0x25   :  { %s1185_s30 = scalar_lea.hbm %s1403_s3, 4096 }
  0x26   :  { %p1186_p2 = scmp.ne.s32.totalorder %s1403_s3, %s1185_s30  ;;  %p1189_p3 = scmp.lt.u32.totalorder %s1185_s30, %s1403_s3 }
  0x28   :  { %p1191_p4 = pnand %p1189_p3, %p1186_p2 }
  0x2a   :  { %1194 = shalt.err (!%p1191_p4)
}
  0x2b   :  { %s1195_s14 = scalar_lea.vmem %s46_s18, 4096  ;;  %p1200_p6 = scmp.lt.s32.totalorder %s46_s18, %s46_s18 }
  0x2c   :  { %p1196_p5 = scmp.ne.s32.totalorder %s46_s18, %s1195_s14  ;;  %p1201_p7 = scmp.lt.s32.totalorder %s1195_s14, %s1195_s14 }
  0x2e   :  { %p1202_p8 = por %p1201_p7, %p1200_p6 }
  0x30   :  { %p1203_p9 = pnand %p1202_p8, %p1196_p5 }
  0x32   :  { %1206 = shalt.err (!%p1203_p9)
}
  0x33   :  { %51 = dma.hbm_to_vmem [thread:$0]  %s1403_s3, 4096, %s46_s18, [#allocation6], %s1260_s11, %s1260_s11, %s1261_s12  }
  0x34   :  { %s1264_s16 = smov [#allocation8]   ;;  %s1207_s21 = scalar_lea.hbm %s1405_s5, 4096 }
  0x35   :  { %s59_s17 = sshll.u32 %s1264_s16, 4  ;;  %p1208_p10 = scmp.ne.s32.totalorder %s1405_s5, %s1207_s21  ;;  %s60_s17 = int_to_ptr.vmem [resolvable:$true] %s59_s17 }
  0x36   :  { %p1211_p11 = scmp.lt.u32.totalorder %s1207_s21, %s1405_s5 }
  0x38   :  { %p1213_p12 = pnand %p1211_p11, %p1208_p10 }
  0x3a   :  { %1216 = shalt.err (!%p1213_p12)
}
  0x3b   :  { %s1217_s1 = scalar_lea.vmem %s60_s17, 4096  ;;  %p1222_p0 = scmp.lt.s32.totalorder %s60_s17, %s60_s17 }
  0x3c   :  { %p1218_p13 = scmp.ne.s32.totalorder %s60_s17, %s1217_s1  ;;  %p1223_p1 = scmp.lt.s32.totalorder %s1217_s1, %s1217_s1 }
  0x3e   :  { %p1224_p2 = por %p1223_p1, %p1222_p0 }
  0x40   :  { %p1225_p3 = pnand %p1224_p2, %p1218_p13 }
  0x42   :  { %1228 = shalt.err (!%p1225_p3)
}
  0x43   :  { %65 = dma.hbm_to_vmem [thread:$0]  %s1405_s5, 4096, %s60_s17, [#allocation9], %s1260_s11, %s1260_s11, %s1261_s12  }
  0x44   :  { %1251 = dma.done.wait [#allocation3], 128  }
  0x45   :  { %1252 = vsyncadd [#allocation3], 4294967168 }
  0x46   :  { %1253 = dma.done.wait [#allocation6], 8192  }
  0x47   :  { %1254 = vsyncadd [#allocation6], 4294959104 }
  0x48   :  { %1255 = dma.done.wait [#allocation9], 4096  }
  0x49   :  { %1256 = vsyncadd [#allocation9], 4294963200  ;;  %v987_v0 = vld [vmem:[#allocation5 + $0x4] ss:$8 sps:$4 sm:$0xff]   ;;  %v989_v1 = vld [vmem:[#allocation5] ss:$8 sps:$4 sm:$0xff]  }
  0x4a   :  { %292 = vmatprep.subr.bf16.mxu0 %v987_v0  ;;  %v990_v2 = vld [vmem:[#allocation5 + $0x14] ss:$8 sps:$4 sm:$0xff]   ;;  %v992_v3 = vld [vmem:[#allocation5 + $0x10] ss:$8 sps:$4 sm:$0xff]   ;;  %v993_v4 = vld [vmem:[#allocation5 + $0x24] ss:$8 sps:$4 sm:$0xff]  }
  0x4b   :  { %293 = vmatpush1.bf16.msra.mxu0 %v989_v1  ;;  %v995_v5 = vld [vmem:[#allocation5 + $0x20] ss:$8 sps:$4 sm:$0xff]   ;;  %v996_v6 = vld [vmem:[#allocation5 + $0x34] ss:$8 sps:$4 sm:$0xff]   ;;  %v998_v7 = vld [vmem:[#allocation5 + $0x30] ss:$8 sps:$4 sm:$0xff]  }
  0x4c   :  { %294 = vmatprep.subr.bf16.mxu0 %v990_v2  ;;  %v999_v8 = vld [vmem:[#allocation5 + $0x44] ss:$8 sps:$4 sm:$0xff]   ;;  %v1001_v9 = vld [vmem:[#allocation5 + $0x40] ss:$8 sps:$4 sm:$0xff]   ;;  %v1002_v10 = vld [vmem:[#allocation5 + $0x54] ss:$8 sps:$4 sm:$0xff]  }
  0x4d   :  { %v1004_v11 = vld [vmem:[#allocation5 + $0x50] ss:$8 sps:$4 sm:$0xff]   ;;  %v1005_v12 = vld [vmem:[#allocation5 + $0x64] ss:$8 sps:$4 sm:$0xff]   ;;  %v1007_v13 = vld [vmem:[#allocation5 + $0x60] ss:$8 sps:$4 sm:$0xff]  }
  0x4e   :  { %v1363_v14 = vld [vmem:[#allocation2] sm:$0xff]  ;;  %v1037_v16 = vld [vmem:[#allocation7 + $0x4] ss:$8 sps:$4 sm:$0xff]   ;;  %v1039_v17 = vld [vmem:[#allocation7] ss:$8 sps:$4 sm:$0xff]   ;;  %s1265_s27 = smov [#allocation10]  }
  0x4f   :  { %295 = vmatpush1.bf16.msra.mxu0 %v992_v3  ;;  %v883_v15 = vcombine.high %v1363_v14, %v1363_v14  ;;  %v1040_v18 = vld [vmem:[#allocation7 + $0x14] ss:$8 sps:$4 sm:$0xff]   ;;  %557 = vmatprep.subr.bf16.mxu1 %v1037_v16  ;;  %v1010_v20 = vld [vmem:[#allocation5 + $0x70] ss:$8 sps:$4 sm:$0xff]   ;;  %v1043_v22 = vld [vmem:[#allocation7 + $0x24] ss:$8 sps:$4 sm:$0xff]   ;;  %v882_v50 = vcombine.low %v1363_v14, %v1363_v14 }
  0x50   :  { %296 = vmatprep.subr.bf16.mxu0 %v993_v4  ;;  %v1008_v19 = vld [vmem:[#allocation5 + $0x74] ss:$8 sps:$4 sm:$0xff]   ;;  %558 = vmatpush1.bf16.msra.mxu1 %v1039_v17  ;;  %v1042_v21 = vld [vmem:[#allocation7 + $0x10] ss:$8 sps:$4 sm:$0xff]   ;;  %v1011_v23 = vld [vmem:[#allocation5 + $0x84] ss:$8 sps:$4 sm:$0xff]  }
  0x51   :  { %324 = vmatprep.mubr.bf16.mxu0 %v883_v15  ;;  %559 = vmatprep.subr.bf16.mxu1 %v1040_v18  ;;  %v1013_v24 = vld [vmem:[#allocation5 + $0x80] ss:$8 sps:$4 sm:$0xff]   ;;  %v1046_v26 = vld [vmem:[#allocation7 + $0x34] ss:$8 sps:$4 sm:$0xff]   ;;  %v1048_v28 = vld [vmem:[#allocation7 + $0x30] ss:$8 sps:$4 sm:$0xff]  }
  0x52   :  { %v1045_v25 = vld [vmem:[#allocation7 + $0x20] ss:$8 sps:$4 sm:$0xff]   ;;  %v1014_v27 = vld [vmem:[#allocation5 + $0x94] ss:$8 sps:$4 sm:$0xff]   ;;  %v1016_v29 = vld [vmem:[#allocation5 + $0x90] ss:$8 sps:$4 sm:$0xff]  }
  0x53   :  { %297 = vmatpush1.bf16.msra.mxu0 %v995_v5  ;;  %v1049_v30 = vld [vmem:[#allocation7 + $0x44] ss:$8 sps:$4 sm:$0xff]   ;;  %v1051_v32 = vld [vmem:[#allocation7 + $0x40] ss:$8 sps:$4 sm:$0xff]   ;;  %v1052_v34 = vld [vmem:[#allocation7 + $0x54] ss:$8 sps:$4 sm:$0xff]  }
  0x54   :  { %298 = vmatprep.subr.bf16.mxu0 %v996_v6  ;;  %560 = vmatpush1.bf16.msra.mxu1 %v1042_v21  ;;  %v1017_v31 = vld [vmem:[#allocation5 + $0xa4] ss:$8 sps:$4 sm:$0xff]   ;;  %v1019_v33 = vld [vmem:[#allocation5 + $0xa0] ss:$8 sps:$4 sm:$0xff]   ;;  %v1020_v35 = vld [vmem:[#allocation5 + $0xb4] ss:$8 sps:$4 sm:$0xff]  }
  0x55   :  { %561 = vmatprep.subr.bf16.mxu1 %v1043_v22  ;;  %v1054_v36 = vld [vmem:[#allocation7 + $0x50] ss:$8 sps:$4 sm:$0xff]   ;;  %v1055_v38 = vld [vmem:[#allocation7 + $0x64] ss:$8 sps:$4 sm:$0xff]   ;;  %v1057_v40 = vld [vmem:[#allocation7 + $0x60] ss:$8 sps:$4 sm:$0xff]  }
  0x56   :  { %v1022_v37 = vld [vmem:[#allocation5 + $0xb0] ss:$8 sps:$4 sm:$0xff]   ;;  %v1023_v39 = vld [vmem:[#allocation5 + $0xc4] ss:$8 sps:$4 sm:$0xff]   ;;  %v1025_v41 = vld [vmem:[#allocation5 + $0xc0] ss:$8 sps:$4 sm:$0xff]  }
  0x57   :  { %299 = vmatpush1.bf16.msra.mxu0 %v998_v7  ;;  %v1058_v42 = vld [vmem:[#allocation7 + $0x74] ss:$8 sps:$4 sm:$0xff]   ;;  %v1060_v44 = vld [vmem:[#allocation7 + $0x70] ss:$8 sps:$4 sm:$0xff]   ;;  %v1029_v46 = vld [vmem:[#allocation5 + $0xe4] ss:$8 sps:$4 sm:$0xff]  }
  0x58   :  { %300 = vmatprep.subr.bf16.mxu0 %v999_v8  ;;  %562 = vmatpush1.bf16.msra.mxu1 %v1045_v25  ;;  %v1026_v43 = vld [vmem:[#allocation5 + $0xd4] ss:$8 sps:$4 sm:$0xff]   ;;  %v1028_v45 = vld [vmem:[#allocation5 + $0xd0] ss:$8 sps:$4 sm:$0xff]   ;;  %v1031_v47 = vld [vmem:[#allocation5 + $0xe0] ss:$8 sps:$4 sm:$0xff]  }
  0x59   :  { %563 = vmatprep.subr.bf16.mxu1 %v1046_v26  ;;  %v1032_v48 = vld [vmem:[#allocation5 + $0xf4] ss:$8 sps:$4 sm:$0xff]   ;;  %v1034_v49 = vld [vmem:[#allocation5 + $0xf0] ss:$8 sps:$4 sm:$0xff]   ;;  %v1061_v51 = vld [vmem:[#allocation7 + $0x84] ss:$8 sps:$4 sm:$0xff]  }
  0x5a   :  { %v1063_v52 = vld [vmem:[#allocation7 + $0x80] ss:$8 sps:$4 sm:$0xff]   ;;  %v1064_v53 = vld [vmem:[#allocation7 + $0x94] ss:$8 sps:$4 sm:$0xff]   ;;  %v1066_v54 = vld [vmem:[#allocation7 + $0x90] ss:$8 sps:$4 sm:$0xff]  }
  0x5b   :  { %301 = vmatpush1.bf16.msra.mxu0 %v1001_v9  ;;  %v1067_v55 = vld [vmem:[#allocation7 + $0xa4] ss:$8 sps:$4 sm:$0xff]   ;;  %v1069_v56 = vld [vmem:[#allocation7 + $0xa0] ss:$8 sps:$4 sm:$0xff]   ;;  %v1070_v57 = vld [vmem:[#allocation7 + $0xb4] ss:$8 sps:$4 sm:$0xff]  }
  0x5c   :  { %302 = vmatprep.subr.bf16.mxu0 %v1002_v10  ;;  %564 = vmatpush1.bf16.msra.mxu1 %v1048_v28  ;;  %v1072_v58 = vld [vmem:[#allocation7 + $0xb0] ss:$8 sps:$4 sm:$0xff]   ;;  %v1073_v59 = vld [vmem:[#allocation7 + $0xc4] ss:$8 sps:$4 sm:$0xff]   ;;  %v1075_v60 = vld [vmem:[#allocation7 + $0xc0] ss:$8 sps:$4 sm:$0xff]  }
  0x5d   :  { %565 = vmatprep.subr.bf16.mxu1 %v1049_v30  ;;  %v1076_v61 = vld [vmem:[#allocation7 + $0xd4] ss:$8 sps:$4 sm:$0xff]   ;;  %v1078_v62 = vld [vmem:[#allocation7 + $0xd0] ss:$8 sps:$4 sm:$0xff]   ;;  %v1079_v63 = vld [vmem:[#allocation7 + $0xe4] ss:$8 sps:$4 sm:$0xff]  }
  0x5e   :  { %v1081_v0 = vld [vmem:[#allocation7 + $0xe0] ss:$8 sps:$4 sm:$0xff]   ;;  %v1082_v1 = vld [vmem:[#allocation7 + $0xf4] ss:$8 sps:$4 sm:$0xff]   ;;  %v1084_v2 = vld [vmem:[#allocation7 + $0xf0] ss:$8 sps:$4 sm:$0xff]  }
  0x5f   :  { %303 = vmatpush1.bf16.msra.mxu0 %v1004_v11  ;;  %v1085_v3 = vld [vmem:[#allocation8] ss:$8 sps:$4 sm:$0xff]   ;;  %v1087_v4 = vld [vmem:[#allocation8 + $0x4] ss:$8 sps:$4 sm:$0xff]   ;;  %v1090_v5 = vld [vmem:[#allocation8 + $0x14] ss:$8 sps:$4 sm:$0xff]  }
  0x60   :  { %304 = vmatprep.subr.bf16.mxu0 %v1005_v12  ;;  %566 = vmatpush1.bf16.msra.mxu1 %v1051_v32  ;;  %v1088_v6 = vld [vmem:[#allocation8 + $0x10] ss:$8 sps:$4 sm:$0xff]   ;;  %v1093_v7 = vld [vmem:[#allocation8 + $0x24] ss:$8 sps:$4 sm:$0xff]   ;;  %v1091_v8 = vld [vmem:[#allocation8 + $0x20] ss:$8 sps:$4 sm:$0xff]  }
  0x61   :  { %567 = vmatprep.subr.bf16.mxu1 %v1052_v34  ;;  %v1096_v9 = vld [vmem:[#allocation8 + $0x34] ss:$8 sps:$4 sm:$0xff]   ;;  %v1094_v10 = vld [vmem:[#allocation8 + $0x30] ss:$8 sps:$4 sm:$0xff]   ;;  %v1099_v11 = vld [vmem:[#allocation8 + $0x44] ss:$8 sps:$4 sm:$0xff]  }
  0x62   :  { %v1097_v12 = vld [vmem:[#allocation8 + $0x40] ss:$8 sps:$4 sm:$0xff]   ;;  %v1100_v14 = vld [vmem:[#allocation8 + $0x50] ss:$8 sps:$4 sm:$0xff]   ;;  %v1105_v15 = vld [vmem:[#allocation8 + $0x64] ss:$8 sps:$4 sm:$0xff]  }
  0x63   :  { %305 = vmatpush1.bf16.msra.mxu0 %v1007_v13  ;;  %v1102_v13 = vld [vmem:[#allocation8 + $0x54] ss:$8 sps:$4 sm:$0xff]   ;;  %v1103_v16 = vld [vmem:[#allocation8 + $0x60] ss:$8 sps:$4 sm:$0xff]   ;;  %v1106_v18 = vld [vmem:[#allocation8 + $0x70] ss:$8 sps:$4 sm:$0xff]  }
  0x64   :  { %306 = vmatprep.subr.bf16.mxu0 %v1008_v19  ;;  %568 = vmatpush1.bf16.msra.mxu1 %v1054_v36  ;;  %v1108_v17 = vld [vmem:[#allocation8 + $0x74] ss:$8 sps:$4 sm:$0xff]   ;;  %v115_v19 = vlaneseq  ;;  %v113_v22 = vld [vmem:[%s1402_s2] sm:$0x3]  ;;  %s871_s28 = sshll.u32 %s1265_s27, 4  ;;  %s872_s28 = int_to_ptr.vmem [resolvable:$true] %s871_s28 }
  0x65   :  { %569 = vmatprep.subr.bf16.mxu1 %v1055_v38  ;;  %s1229_s29 = scalar_lea.vmem %s872_s28, 256  ;;  %p1234_p5 = scmp.lt.s32.totalorder %s872_s28, %s872_s28 }
  0x66   :  { %p1230_p4 = scmp.ne.s32.totalorder %s872_s28, %s1229_s29  ;;  %p1235_p6 = scmp.lt.s32.totalorder %s1229_s29, %s1229_s29 }
  0x67   :  { %307 = vmatpush1.bf16.msra.mxu0 %v1010_v20  ;;  %v116_v20 = vshrl.u32 %v115_v19, 7 }
  0x68   :  { %308 = vmatprep.subr.bf16.mxu0 %v1011_v23  ;;  %570 = vmatpush1.bf16.msra.mxu1 %v1057_v40  ;;  %p1236_p7 = por %p1235_p6, %p1234_p5 }
  0x69   :  { %571 = vmatprep.subr.bf16.mxu1 %v1058_v42  ;;  %v1369_v21 = vsub.s32 0, %v116_v20  ;;  %v1374_v23 = vsub.s32 1, %v116_v20 }
  0x6a   :  { %p1237_p8 = pnand %p1236_p7, %p1230_p4 }
  0x6b   :  { %309 = vmatpush1.bf16.msra.mxu0 %v1013_v24  ;;  %v118_v24 = vrot.slane %v113_v22, %v1369_v21  ;;  %v122_v25 = vrot.slane %v113_v22, %v1374_v23 }
  0x6c   :  { %310 = vmatprep.subr.bf16.mxu0 %v1014_v27  ;;  %572 = vmatpush1.bf16.msra.mxu1 %v1060_v44 }
  0x6d   :  { %573 = vmatprep.subr.bf16.mxu1 %v1061_v51 }
  0x6f   :  { %311 = vmatpush1.bf16.msra.mxu0 %v1016_v29 }
  0x70   :  { %312 = vmatprep.subr.bf16.mxu0 %v1017_v31  ;;  %574 = vmatpush1.bf16.msra.mxu1 %v1063_v52  ;;  %v1111_v52 = vld [vmem:[#allocation8 + $0x84] ss:$8 sps:$4 sm:$0xff]  }
  0x71   :  { %575 = vmatprep.subr.bf16.mxu1 %v1064_v53  ;;  %v1109_v53 = vld [vmem:[#allocation8 + $0x80] ss:$8 sps:$4 sm:$0xff]  }
  0x73   :  { %313 = vmatpush1.bf16.msra.mxu0 %v1019_v33 }
  0x74   :  { %314 = vmatprep.subr.bf16.mxu0 %v1020_v35  ;;  %576 = vmatpush1.bf16.msra.mxu1 %v1066_v54  ;;  %v1114_v54 = vld [vmem:[#allocation8 + $0x94] ss:$8 sps:$4 sm:$0xff]  }
  0x75   :  { %577 = vmatprep.subr.bf16.mxu1 %v1067_v55  ;;  %v1112_v55 = vld [vmem:[#allocation8 + $0x90] ss:$8 sps:$4 sm:$0xff]  }
  0x77   :  { %315 = vmatpush1.bf16.msra.mxu0 %v1022_v37 }
  0x78   :  { %316 = vmatprep.subr.bf16.mxu0 %v1023_v39  ;;  %578 = vmatpush1.bf16.msra.mxu1 %v1069_v56  ;;  %v1117_v56 = vld [vmem:[#allocation8 + $0xa4] ss:$8 sps:$4 sm:$0xff]  }
  0x79   :  { %579 = vmatprep.subr.bf16.mxu1 %v1070_v57  ;;  %v1115_v57 = vld [vmem:[#allocation8 + $0xa0] ss:$8 sps:$4 sm:$0xff]  }
  0x7b   :  { %317 = vmatpush1.bf16.msra.mxu0 %v1025_v41 }
  0x7c   :  { %318 = vmatprep.subr.bf16.mxu0 %v1026_v43  ;;  %580 = vmatpush1.bf16.msra.mxu1 %v1072_v58  ;;  %v1120_v58 = vld [vmem:[#allocation8 + $0xb4] ss:$8 sps:$4 sm:$0xff]  }
  0x7d   :  { %581 = vmatprep.subr.bf16.mxu1 %v1073_v59  ;;  %v1118_v59 = vld [vmem:[#allocation8 + $0xb0] ss:$8 sps:$4 sm:$0xff]  }
  0x7f   :  { %319 = vmatpush1.bf16.msra.mxu0 %v1028_v45 }
  0x80   :  { %320 = vmatprep.subr.bf16.mxu0 %v1029_v46  ;;  %582 = vmatpush1.bf16.msra.mxu1 %v1075_v60  ;;  %v1123_v60 = vld [vmem:[#allocation8 + $0xc4] ss:$8 sps:$4 sm:$0xff]  }
  0x81   :  { %583 = vmatprep.subr.bf16.mxu1 %v1076_v61  ;;  %v1121_v61 = vld [vmem:[#allocation8 + $0xc0] ss:$8 sps:$4 sm:$0xff]  }
  0x83   :  { %321 = vmatpush1.bf16.msra.mxu0 %v1031_v47 }
  0x84   :  { %322 = vmatprep.subr.bf16.mxu0 %v1032_v48  ;;  %584 = vmatpush1.bf16.msra.mxu1 %v1078_v62  ;;  %v1126_v62 = vld [vmem:[#allocation8 + $0xd4] ss:$8 sps:$4 sm:$0xff]  }
  0x85   :  { %585 = vmatprep.subr.bf16.mxu1 %v1079_v63  ;;  %v1124_v63 = vld [vmem:[#allocation8 + $0xd0] ss:$8 sps:$4 sm:$0xff]  }
  0x87   :  { %323 = vmatpush1.bf16.msra.mxu0 %v1034_v49 }
  0x88   :  { %586 = vmatpush1.bf16.msra.mxu1 %v1081_v0  ;;  %822 = vmatprep.subr.bf16.mxu0 %v1087_v4  ;;  %v1129_v0 = vld [vmem:[#allocation8 + $0xe4] ss:$8 sps:$4 sm:$0xff]   ;;  %v385_v4 = vld [vmem:[%s1404_s4] sm:$0x3] }
  0x89   :  { %587 = vmatprep.subr.bf16.mxu1 %v1082_v1  ;;  %v1127_v1 = vld [vmem:[#allocation8 + $0xe0] ss:$8 sps:$4 sm:$0xff]  }
  0x8a   :  { %325 = vmatmul.mubr.bf16.vlgmr.msra.gmra.mrb[0].mxu0 %v882_v50 }
  0x8b   :  { %823 = vmatpush1.bf16.msra.mxu0 %v1085_v3  ;;  %v1130_v3 = vld [vmem:[#allocation8 + $0xf0] ss:$8 sps:$4 sm:$0xff]  }
  0x8c   :  { %588 = vmatpush1.bf16.msra.mxu1 %v1084_v2  ;;  %824 = vmatprep.subr.bf16.mxu0 %v1090_v5  ;;  %v1132_v2 = vld [vmem:[#allocation8 + $0xf4] ss:$8 sps:$4 sm:$0xff]   ;;  %v390_v5 = vrot.slane %v385_v4, %v1369_v21 }
  0x8f   :  { %825 = vmatpush1.bf16.msra.mxu0 %v1088_v6  ;;  %v394_v6 = vrot.slane %v385_v4, %v1374_v23 }
  0x90   :  { %826 = vmatprep.subr.bf16.mxu0 %v1093_v7 }
  0x93   :  { %827 = vmatpush1.bf16.msra.mxu0 %v1091_v8 }
  0x94   :  { %828 = vmatprep.subr.bf16.mxu0 %v1096_v9 }
  0x97   :  { %829 = vmatpush1.bf16.msra.mxu0 %v1094_v10 }
  0x98   :  { %830 = vmatprep.subr.bf16.mxu0 %v1099_v11 }
  0x9b   :  { %831 = vmatpush1.bf16.msra.mxu0 %v1097_v12 }
  0x9c   :  { %832 = vmatprep.subr.bf16.mxu0 %v1102_v13 }
  0x9f   :  { %833 = vmatpush1.bf16.msra.mxu0 %v1100_v14 }
  0xa0   :  { %834 = vmatprep.subr.bf16.mxu0 %v1105_v15 }
  0xa3   :  { %835 = vmatpush1.bf16.msra.mxu0 %v1103_v16 }
  0xa4   :  { %836 = vmatprep.subr.bf16.mxu0 %v1108_v17 }
  0xa7   :  { %837 = vmatpush1.bf16.msra.mxu0 %v1106_v18 }
  0xa8   :  { %838 = vmatprep.subr.bf16.mxu0 %v1111_v52 }
  0xab   :  { %839 = vmatpush1.bf16.msra.mxu0 %v1109_v53 }
  0xac   :  { %840 = vmatprep.subr.bf16.mxu0 %v1114_v54 }
  0xaf   :  { %841 = vmatpush1.bf16.msra.mxu0 %v1112_v55 }
  0xb0   :  { %842 = vmatprep.subr.bf16.mxu0 %v1117_v56 }
  0xb3   :  { %843 = vmatpush1.bf16.msra.mxu0 %v1115_v57 }
  0xb4   :  { %844 = vmatprep.subr.bf16.mxu0 %v1120_v58 }
  0xb7   :  { %845 = vmatpush1.bf16.msra.mxu0 %v1118_v59 }
  0xb8   :  { %846 = vmatprep.subr.bf16.mxu0 %v1123_v60 }
  0xbb   :  { %847 = vmatpush1.bf16.msra.mxu0 %v1121_v61 }
  0xbc   :  { %848 = vmatprep.subr.bf16.mxu0 %v1126_v62 }
  0xbf   :  { %849 = vmatpush1.bf16.msra.mxu0 %v1124_v63 }
  0xc0   :  { %850 = vmatprep.subr.bf16.mxu0 %v1129_v0 }
  0xc3   :  { %851 = vmatpush1.bf16.msra.mxu0 %v1127_v1 }
  0xc4   :  { %852 = vmatprep.subr.bf16.mxu0 %v1132_v2 }
  0xc7   :  { %853 = vmatpush1.bf16.msra.mxu0 %v1130_v3 }
 0x15d   :  { %v326_v26 = vpop.f32.mrb[0].mxu0 }
 0x15e   :  { %v327_v27 = vadd.f32 %v326_v26, %v118_v24  ;;  %v328_v28 = vpop.f32.mrb[1].mxu0 }
 0x15f   :  { %v329_v29 = vadd.f32 %v328_v28, %v122_v25  ;;  %v330_v30 = vpop.f32.mrb[2].mxu0 }
 0x160   :  { %v333_v31 = vmul.f32 %v327_v27, %v327_v27  ;;  %v331_v32 = vpop.f32.mrb[3].mxu0 }
 0x161   :  { %v334_v33 = vmul.f32 %v329_v29, %v329_v29 }
 0x162   :  { %v335_v34 = vmul.f32 %v333_v31, %v327_v27 }
 0x163   :  { %v336_v35 = vmul.f32 %v334_v33, %v329_v29 }
 0x164   :  { %v337_v36 = vmul.f32 0.044715, %v335_v34 }
 0x165   :  { %v338_v37 = vmul.f32 0.044715, %v336_v35  ;;  %v650_v35 = vld [vmem:[%s1406_s6] sm:$0x3] }
 0x166   :  { %v339_v38 = vadd.f32 %v337_v36, %v327_v27  ;;  %v655_v36 = vrot.slane %v650_v35, %v1369_v21 }
 0x167   :  { %v340_v39 = vadd.f32 %v338_v37, %v329_v29  ;;  %v659_v37 = vrot.slane %v650_v35, %v1374_v23 }
 0x168   :  { %v341_v40 = vmul.f32 0.7978846, %v339_v38 }
 0x169   :  { %v342_v41 = vmul.f32 0.7978846, %v340_v39 }
 0x16a   :  { %1133 = vtanh.f32 %v341_v40 }
 0x16b   :  { %1135 = vtanh.f32 %v342_v41 }
 0x174   :  { %v1134_v42 = vpop.eup %1133 }
 0x175   :  { %v1136_v43 = vpop.eup %1135  ;;  %v345_v44 = vadd.f32 1.0, %v1134_v42 }
 0x176   :  { %v346_v45 = vadd.f32 1.0, %v1136_v43 }
 0x177   :  { %v347_v46 = vmul.f32 0.5, %v345_v44 }
 0x178   :  { %v348_v47 = vmul.f32 0.5, %v346_v45 }
 0x179   :  { %v349_v48 = vmul.f32 %v347_v46, %v327_v27 }
 0x17a   :  { %v350_v49 = vmul.f32 %v348_v47, %v329_v29 }
 0x17b   :  { %v351_v51 = vpack.c.bf16 %v349_v48, %v349_v48 }
 0x17c   :  { %v352_v50 = vpack.c.bf16 %v350_v49, %v350_v49 }
 0x17e   :  { %589 = vmatprep.mubr.bf16.mxu1 %v352_v50 }
 0x17f   :  { %590 = vmatmul.mubr.bf16.vlgmr.msra.gmra.mrb[0].mxu1 %v351_v51 }
 0x252   :  { %v591_v7 = vpop.f32.mrb[0].mxu1 }
 0x253   :  { %v592_v8 = vadd.f32 %v591_v7, %v390_v5  ;;  %v593_v9 = vpop.f32.mrb[1].mxu1 }
 0x254   :  { %v594_v10 = vadd.f32 %v593_v9, %v394_v6  ;;  %v595_v11 = vpop.f32.mrb[2].mxu1 }
 0x255   :  { %v598_v12 = vmul.f32 %v592_v8, %v592_v8  ;;  %v596_v13 = vpop.f32.mrb[3].mxu1 }
 0x256   :  { %v599_v14 = vmul.f32 %v594_v10, %v594_v10 }
 0x257   :  { %v600_v15 = vmul.f32 %v598_v12, %v592_v8 }
 0x258   :  { %v601_v16 = vmul.f32 %v599_v14, %v594_v10 }
 0x259   :  { %v602_v17 = vmul.f32 0.044715, %v600_v15 }
 0x25a   :  { %v603_v18 = vmul.f32 0.044715, %v601_v16 }
 0x25b   :  { %v604_v19 = vadd.f32 %v602_v17, %v592_v8 }
 0x25c   :  { %v605_v20 = vadd.f32 %v603_v18, %v594_v10 }
 0x25d   :  { %v606_v22 = vmul.f32 0.7978846, %v604_v19 }
 0x25e   :  { %v607_v24 = vmul.f32 0.7978846, %v605_v20 }
 0x25f   :  { %1137 = vtanh.f32 %v606_v22 }
 0x260   :  { %1139 = vtanh.f32 %v607_v24 }
 0x269   :  { %v1138_v25 = vpop.eup %1137 }
 0x26a   :  { %v1140_v26 = vpop.eup %1139  ;;  %v610_v27 = vadd.f32 1.0, %v1138_v25 }
 0x26b   :  { %v611_v28 = vadd.f32 1.0, %v1140_v26 }
 0x26c   :  { %v612_v29 = vmul.f32 0.5, %v610_v27 }
 0x26d   :  { %v613_v30 = vmul.f32 0.5, %v611_v28 }
 0x26e   :  { %v614_v31 = vmul.f32 %v612_v29, %v592_v8 }
 0x26f   :  { %v615_v32 = vmul.f32 %v613_v30, %v594_v10 }
 0x270   :  { %v616_v34 = vpack.c.bf16 %v614_v31, %v614_v31 }
 0x271   :  { %v617_v33 = vpack.c.bf16 %v615_v32, %v615_v32 }
 0x273   :  { %854 = vmatprep.mubr.bf16.mxu0 %v617_v33 }
 0x274   :  { %855 = vmatmul.mubr.bf16.vlgmr.msra.gmra.mrb[4].mxu0 %v616_v34 }
 0x347   :  { %v856_v38 = vpop.f32.mrb[4].mxu0 }
 0x348   :  { %v857_v39 = vadd.f32 %v856_v38, %v655_v36  ;;  %v858_v40 = vpop.f32.mrb[5].mxu0 }
 0x349   :  { %v859_v41 = vadd.f32 %v858_v40, %v659_v37  ;;  %v860_v42 = vpop.f32.mrb[6].mxu0 }
 0x34a   :  { %863 = vst [vmem:[#allocation10] sm:$0xff] %v857_v39  ;;  %v861_v43 = vpop.f32.mrb[7].mxu0 }
 0x34b   :  { %864 = vst [vmem:[#allocation10 + $0x8] sm:$0xff] %v859_v41 }
 0x34c   :  { %1240 = shalt.err (!%p1237_p8)
}
 0x34d   :  { %s1241_s8 = scalar_lea.hbm %s1407_s7, 256 }
 0x34e   :  { %p1242_p9 = scmp.ne.s32.totalorder %s1407_s7, %s1241_s8  ;;  %p1245_p10 = scmp.lt.u32.totalorder %s1241_s8, %s1407_s7 }
 0x350   :  { %p1247_p11 = pnand %p1245_p10, %p1242_p9 }
 0x352   :  { %1250 = shalt.err (!%p1247_p11)
}
 0x353   :  { %874 = dma.vmem_to_hbm [thread:$0]  %s872_s28, 256, %s1407_s7, [#allocation4]  }
 0x354   :  { %1257 = dma.done.wait [#allocation4], 256  }
 0x355   :  { %1258 = vsyncadd [#allocation4], 4294967040 }
 0x356   :  { %878 = vsyncpa [#allocation3], 1 }
 0x357   :  { %879 = vsyncpa [#allocation6], 1 }
 0x358   :  { %880 = vsyncpa [#allocation9], 1 }
 0x359   :  { %881 = vsyncpa [#allocation4], 1 }

</bundles_post_ra>
